<compile_context>
chip_gen: v5e
topology: v5e:2x2
jax: 0.10.0
libtpu: 0.0.40
codegen_flags: <defaults>
</compile_context>

<pallas_src>
import functools

import jax
import jax.numpy as jnp
from jax.experimental import pallas as pl
from jax.experimental.pallas import tpu as pltpu

_LN_EPS = 1e-5
_BN_EPS = 1e-5
_VMEM_LIMIT = 48 * 1024 * 1024   # < 64 MiB physical VMEM on v7x, safe on v5e/v6e


# ----------------------------------------------------------------------------- helpers
def _gelu(x):
    # tanh-approx GELU (torch GELU(approximate='tanh')); tanh runs on the EUP slot.
    c = 0.7978845608028654  # sqrt(2/pi)
    return 0.5 * x * (1.0 + jnp.tanh(c * (x + 0.044715 * x * x * x)))


def _silu(x):
    return x * jax.nn.sigmoid(x)


def _full_spec(a):
    nd = a.ndim
    return pl.BlockSpec(a.shape, lambda *_: (0,) * nd)


def _pick_batch_tile(B, hw, target_rows=256):
    """Largest divisor of B whose block gives ~target_rows matmul rows, while
    keeping >=2 grid steps when B allows (megacore / pipeline depth)."""
    target = max(1, target_rows // max(1, hw))
    bt = 1
    for cand in range(1, B + 1):
        if B % cand == 0 and cand <= target:
            bt = cand
    while B // bt < 2 and bt > 1:
        bt = max(d for d in range(1, bt) if B % d == 0)
    return bt


# --------------------------------------------------------------- kernel 1: fused MBConv
def _mbconv_kernel(x_ref, w0_ref, t0_ref, wdw_ref, t1_ref, sew1_ref, sew2_ref,
                   w2_ref, t2_ref, o_ref, hp_ref):
    BT, H, W, C = x_ref.shape
    hidden = w0_ref.shape[1]
    x = x_ref[...].astype(jnp.float32)                     # (BT, H, W, C)
    x2 = x.reshape(BT * H * W, C)

    # 1x1 expand conv (BN folded into w0/t0) + GELU  -- bf16 operands, f32 accum
    h = _gelu(jnp.dot(x2.astype(jnp.bfloat16), w0_ref[...],
                      preferred_element_type=jnp.float32) + t0_ref[...])

    # zero the padded scratch only once: the interior is fully rewritten each
    # grid step and the 1-wide zero border persists across steps.
    @pl.when(pl.program_id(0) == 0)
    def _():
        hp_ref[...] = jnp.zeros_like(hp_ref)
    hp_ref[:, 1:H + 1, 1:W + 1, :] = h.reshape(BT, H, W, hidden)

    # depthwise 3x3 conv (BN folded into taps) on the VPU, f32
    # TODO(synk): if a bundle dump shows XLU/relayout pressure here, switch the
    # unaligned slices to pltpu.roll-based shifts of a single resident load.
    wdw = wdw_ref[...]                                     # (3, 3, hidden)
    hp = hp_ref[...]                                       # (BT, H+2, W+2, hidden)
    acc = jnp.zeros((BT, H, W, hidden), jnp.float32)
    for di in range(3):
        for dj in range(3):
            acc = acc + hp[:, di:di + H, dj:dj + W, :] * wdw[di, dj]
    y = _gelu(acc + t1_ref[0])                             # (BT, H, W, hidden)

    # squeeze-excitation: per-image mean -> Linear -> SiLU -> Linear -> sigmoid gate
    m = jnp.mean(y.reshape(BT, H * W, hidden), axis=1)     # (BT, hidden)
    g = _silu(jnp.dot(m.astype(jnp.bfloat16), sew1_ref[...],
                      preferred_element_type=jnp.float32))
    gate = jax.nn.sigmoid(jnp.dot(g.astype(jnp.bfloat16), sew2_ref[...],
                                  preferred_element_type=jnp.float32))
    y = y * gate[:, None, None, :]

    # 1x1 project conv (BN folded) + MBConv residual
    out = (jnp.dot(y.reshape(BT * H * W, hidden).astype(jnp.bfloat16), w2_ref[...],
                   preferred_element_type=jnp.float32) + t2_ref[...] + x2)
    o_ref[...] = out.reshape(BT, H, W, C).astype(o_ref.dtype)


def prepare_mbconv_params(p):
    """Fold BN scale/shift and conv biases once; pre-cast matmul weights to bf16."""
    hidden = p["w0"].shape[1]
    s0, t0 = p["bn0_scale"], p["bn0_shift"]
    s1, t1 = p["bn1_scale"], p["bn1_shift"]
    s2, t2 = p["bn2_scale"], p["bn2_shift"]
    return dict(
        w0=(p["w0"] * s0).astype(jnp.bfloat16),
        t0=(p["b0"] * s0 + t0).astype(jnp.float32),
        wdw=(p["wdw"] * s1.reshape(1, 1, hidden)).astype(jnp.float32),
        t1=(p["bdw"] * s1 + t1).astype(jnp.float32),
        se_w1=p["se_w1"].astype(jnp.bfloat16),
        se_w2=p["se_w2"].astype(jnp.bfloat16),
        w2=(p["w2"] * s2).astype(jnp.bfloat16),
        t2=(p["b2"] * s2 + t2).astype(jnp.float32),
    )


def mbconv_forward(x, mp):
    # TODO(synk): for large H*W*hidden on v7x (64 MiB VMEM) tile this kernel over
    # H-row stripes with a 1-row halo and carry the SE partial sums across tiles.
    B, H, W, C = x.shape
    hidden = mp["w0"].shape[1]
    bt = _pick_batch_tile(B, H * W)
    img = pl.BlockSpec((bt, H, W, C), lambda b: (b, 0, 0, 0))
    return pl.pallas_call(
        _mbconv_kernel,
        out_shape=jax.ShapeDtypeStruct((B, H, W, C), x.dtype),
        grid=(B // bt,),
        in_specs=[img, _full_spec(mp["w0"]), _full_spec(mp["t0"]),
                  _full_spec(mp["wdw"]), _full_spec(mp["t1"]),
                  _full_spec(mp["se_w1"]), _full_spec(mp["se_w2"]),
                  _full_spec(mp["w2"]), _full_spec(mp["t2"])],
        out_specs=img,
        scratch_shapes=[pltpu.VMEM((bt, H + 2, W + 2, hidden), jnp.float32)],
        compiler_params=pltpu.CompilerParams(
            dimension_semantics=("parallel",), vmem_limit_bytes=_VMEM_LIMIT),
    )(x, mp["w0"], mp["t0"], mp["wdw"], mp["t1"], mp["se_w1"], mp["se_w2"],
      mp["w2"], mp["t2"])


# --------------------------------------- kernel 2: fused PreNorm attention + PreNorm FFN
def _transformer_kernel(x_ref, c_ref, lag_ref, lab_ref, wq_ref, wkv_ref, wo_ref,
                        bias_ref, lfg_ref, lfb_ref, w1_ref, b1_ref, w2_ref, b2_ref,
                        o_ref, *, heads, dim_head, n, d):
    TB = x_ref.shape[0]
    hd = heads * dim_head
    x = x_ref[...].astype(jnp.float32).reshape(TB * n, d)
    c = c_ref[...].astype(jnp.float32).reshape(TB * n, d)

    def layernorm(t, g, b):
        mu = jnp.mean(t, axis=-1, keepdims=True)
        var = jnp.mean(jnp.square(t - mu), axis=-1, keepdims=True)
        return (t - mu) * jax.lax.rsqrt(var + _LN_EPS) * g + b

    # ---- PreNormResidual #1: fn(norm(x), norm(c)) + x,  fn = windowed MHA ----
    xn = layernorm(x, lag_ref[...], lab_ref[...])
    cn = layernorm(c, lag_ref[...], lab_ref[...])

    q = jnp.dot(xn.astype(jnp.bfloat16), wq_ref[...],          # scale folded into wq
                preferred_element_type=jnp.float32)            # (TB*n, hd)
    kv = jnp.dot(cn.astype(jnp.bfloat16), wkv_ref[...],
                 preferred_element_type=jnp.float32)           # (TB*n, 2*hd)

    def split_heads(t):                                        # -> (TB*heads, n, dh)
        t = t.reshape(TB, n, heads, dim_head)
        return jnp.transpose(t, (0, 2, 1, 3)).reshape(TB * heads, n, dim_head)

    qh = split_heads(q)
    kh = split_heads(kv[:, :hd])
    vh = split_heads(kv[:, hd:])

    sim = jnp.einsum('bie,bje->bij', qh.astype(jnp.bfloat16), kh.astype(jnp.bfloat16),
                     preferred_element_type=jnp.float32)       # (TB*heads, n, n)
    sim = sim.reshape(TB, heads, n, n) + bias_ref[...][None]   # rel-pos bias
    sim = sim - jnp.max(sim, axis=-1, keepdims=True)
    p = jnp.exp(sim)
    attn = p * pl.reciprocal(jnp.sum(p, axis=-1, keepdims=True), approx=True)
    attn = attn.reshape(TB * heads, n, n)

    oh = jnp.einsum('bij,bje->bie', attn.astype(jnp.bfloat16), vh.astype(jnp.bfloat16),
                    preferred_element_type=jnp.float32)        # (TB*heads, n, dh)
    oh = jnp.transpose(oh.reshape(TB, heads, n, dim_head),
                       (0, 2, 1, 3)).reshape(TB * n, hd)
    x1 = jnp.dot(oh.astype(jnp.bfloat16), wo_ref[...],
                 preferred_element_type=jnp.float32) + x       # residual #1

    # ---- PreNormResidual #2: fn(norm(x)) + x,  fn = FeedForward ----
    x1n = layernorm(x1, lfg_ref[...], lfb_ref[...])
    hmid = _gelu(jnp.dot(x1n.astype(jnp.bfloat16), w1_ref[...],
                         preferred_element_type=jnp.float32) + b1_ref[...])
    y = jnp.dot(hmid.astype(jnp.bfloat16), w2_ref[...],
                preferred_element_type=jnp.float32) + b2_ref[...]
    o_ref[...] = (y + x1).reshape(TB, n * d).astype(o_ref.dtype)   # residual #2


def prepare_transformer_params(pa, pf, *, heads, dim_head, rel_idx):
    """Fold attention scale, stack K/V, gather rel-pos bias, pre-cast bf16 weights."""
    scale = dim_head ** -0.5
    return dict(
        ln_g=pa["ln_g"].astype(jnp.float32), ln_b=pa["ln_b"].astype(jnp.float32),
        wq=(pa["wq"] * scale).astype(jnp.bfloat16),                 # (d, heads*dh)
        wkv=jnp.concatenate([pa["wk"], pa["wv"]], axis=1).astype(jnp.bfloat16),
        wo=pa["wo"].astype(jnp.bfloat16),                           # (heads*dh, d)
        bias=jnp.transpose(pa["emb"][rel_idx], (2, 0, 1)).astype(jnp.float32),
        f_ln_g=pf["ln_g"].astype(jnp.float32), f_ln_b=pf["ln_b"].astype(jnp.float32),
        w1=pf["w1"].astype(jnp.bfloat16), b1=pf["b1"].astype(jnp.float32),
        w2=pf["w2"].astype(jnp.bfloat16), b2=pf["b2"].astype(jnp.float32),
    )


def transformer_block(x_tok, c_tok, tp, *, heads, dim_head, tb=512):
    Bw, n, d = x_tok.shape
    nd = n * d
    # cap the tile so the parallel grid keeps >=2 steps (v7x megacore), pad Bw
    tb = min(tb, Bw)
    if Bw < 2 * tb and Bw >= 2:
        tb = max(1, Bw // 2)
    Bw_p = ((Bw + tb - 1) // tb) * tb

    # lane-dense 2D token I/O: (Bw, n*d) blocks, no (tb, 4, 32) tile padding
    x2 = x_tok.reshape(Bw, nd)
    c2 = c_tok.reshape(Bw, nd)
    if Bw_p != Bw:
        pad = ((0, Bw_p - Bw), (0, 0))
        x2 = jnp.pad(x2, pad)
        c2 = jnp.pad(c2, pad)

    tok = pl.BlockSpec((tb, nd), lambda i: (i, 0))
    kernel = functools.partial(_transformer_kernel, heads=heads, dim_head=dim_head,
                               n=n, d=d)
    out = pl.pallas_call(
        kernel,
        out_shape=jax.ShapeDtypeStruct((Bw_p, nd), x_tok.dtype),
        grid=(Bw_p // tb,),
        in_specs=[tok, tok,
                  _full_spec(tp["ln_g"]), _full_spec(tp["ln_b"]),
                  _full_spec(tp["wq"]), _full_spec(tp["wkv"]), _full_spec(tp["wo"]),
                  _full_spec(tp["bias"]),
                  _full_spec(tp["f_ln_g"]), _full_spec(tp["f_ln_b"]),
                  _full_spec(tp["w1"]), _full_spec(tp["b1"]),
                  _full_spec(tp["w2"]), _full_spec(tp["b2"])],
        out_specs=tok,
        compiler_params=pltpu.CompilerParams(
            dimension_semantics=("parallel",), vmem_limit_bytes=_VMEM_LIMIT),
    )(x2, c2, tp["ln_g"], tp["ln_b"], tp["wq"], tp["wkv"], tp["wo"], tp["bias"],
      tp["f_ln_g"], tp["f_ln_b"], tp["w1"], tp["b1"], tp["w2"], tp["b2"])
    return out[:Bw].reshape(Bw, n, d)


# ------------------------------------------------------------------ glue (plain JAX)
def block_partition(t, w):                     # 'b (x w1) (y w2) d -> (b x y) (w1 w2) d'
    B, H, W, D = t.shape
    X, Y = H // w, W // w
    t = t.reshape(B, X, w, Y, w, D).transpose(0, 1, 3, 2, 4, 5)
    return t.reshape(B * X * Y, w * w, D)


def block_merge(t, B, H, W, w):                # 'b x y w1 w2 d -> b (x w1) (y w2) d'
    X, Y = H // w, W // w
    D = t.shape[-1]
    t = t.reshape(B, X, Y, w, w, D).transpose(0, 1, 3, 2, 4, 5)
    return t.reshape(B, H, W, D)


def grid_partition(t, w):                      # 'b (w1 x) (w2 y) d -> (b x y) (w1 w2) d'
    B, H, W, D = t.shape
    X, Y = H // w, W // w
    t = t.reshape(B, w, X, w, Y, D).transpose(0, 2, 4, 1, 3, 5)
    return t.reshape(B * X * Y, w * w, D)


def grid_merge(t, B, H, W, w):                 # 'b x y w1 w2 d -> b (w1 x) (w2 y) d'
    X, Y = H // w, W // w
    D = t.shape[-1]
    t = t.reshape(B, X, Y, w, w, D).transpose(0, 3, 1, 4, 2, 5)
    return t.reshape(B, H, W, D)


def rel_pos_indices(w):
    pos = jnp.arange(w)
    gi, gj = jnp.meshgrid(pos, pos, indexing="ij")
    grid = jnp.stack([gi, gj], axis=-1).reshape(w * w, 2)
    rel = grid[:, None, :] - grid[None, :, :] + (w - 1)
    return rel[..., 0] * (2 * w - 1) + rel[..., 1]         # (w*w, w*w)


def prepare_params(params, *, heads, dim_head, w):
    """One-time parameter prep: BN/scale folding, bias gather, bf16 casts."""
    rel_idx = rel_pos_indices(w)
    return dict(
        mbconv=prepare_mbconv_params(params["mbconv"]),
        block=prepare_transformer_params(params["attn_block"], params["ff_block"],
                                         heads=heads, dim_head=dim_head, rel_idx=rel_idx),
        grid=prepare_transformer_params(params["attn_grid"], params["ff_grid"],
                                        heads=heads, dim_head=dim_head, rel_idx=rel_idx),
    )


def spatial_transformer_forward(x_nchw, prep, *, n_heads, d_head, w):
    B, C, H, W_ = x_nchw.shape
    x = jnp.transpose(x_nchw, (0, 2, 3, 1))                # NCHW -> NHWC
    # context = default(context, x); same spatial size, so no pooling branch.
    # TODO(synk): avg_pool2d context-downsampling branch not exercised (context=None).
    c = mbconv_forward(x, prep["mbconv"])                  # proj_in (fused MBConv)

    # block (window) attention + FF, fused per window tile
    xb = block_partition(x, w)
    cb = block_partition(c, w)
    xb = transformer_block(xb, cb, prep["block"], heads=n_heads, dim_head=d_head)
    x = block_merge(xb, B, H, W_, w)

    # grid attention + FF
    xg = grid_partition(x, w)
    cg = grid_partition(c, w)
    xg = transformer_block(xg, cg, prep["grid"], heads=n_heads, dim_head=d_head)
    x = grid_merge(xg, B, H, W_, w)

    return jnp.transpose(x, (0, 3, 1, 2))                  # NHWC -> NCHW


# ------------------------------------------------------------------ parameter init
def init_params(key, dim, heads, d_head, w):
    hidden = 4 * dim                      # MBConv expansion_rate = 4
    se_hidden = hidden // 4               # shrinkage_rate = 0.25
    ff_inner = 4 * dim                    # FeedForward mult = 4
    keys = iter(jax.random.split(key, 64))

    def nrm(shape, s=0.05):
        return (s * jax.random.normal(next(keys), shape)).astype(jnp.float32)

    def bn_fold(c):                       # eval-mode BatchNorm -> per-channel scale/shift
        gamma = 1.0 + nrm((c,), 0.1)
        beta = nrm((c,), 0.1)
        mean = nrm((c,), 0.1)
        var = 1.0 + jnp.abs(nrm((c,), 0.1))
        scale = gamma * jax.lax.rsqrt(var + _BN_EPS)
        shift = beta - mean * scale
        return scale.reshape(1, c), shift.reshape(1, c)

    bn0 = bn_fold(hidden)
    bn1 = bn_fold(hidden)
    bn2 = bn_fold(dim)
    mbconv = dict(
        w0=nrm((dim, hidden)), b0=nrm((hidden,)).reshape(1, hidden),
        bn0_scale=bn0[0], bn0_shift=bn0[1],
        wdw=nrm((3, 3, hidden)), bdw=nrm((hidden,)).reshape(1, hidden),
        bn1_scale=bn1[0], bn1_shift=bn1[1],
        se_w1=nrm((hidden, se_hidden)), se_w2=nrm((se_hidden, hidden)),
        w2=nrm((hidden, dim)), b2=nrm((dim,)).reshape(1, dim),
        bn2_scale=bn2[0], bn2_shift=bn2[1],
    )

    def attn_p():
        return dict(
            ln_g=(1.0 + nrm((dim,), 0.1)).reshape(1, dim),
            ln_b=nrm((dim,), 0.1).reshape(1, dim),
            wq=nrm((dim, dim)), wk=nrm((dim, dim)),
            wv=nrm((dim, dim)), wo=nrm((dim, dim)),
            emb=nrm(((2 * w - 1) ** 2, heads), 0.1),
        )

    def ff_p():
        return dict(
            ln_g=(1.0 + nrm((dim,), 0.1)).reshape(1, dim),
            ln_b=nrm((dim,), 0.1).reshape(1, dim),
            w1=nrm((dim, ff_inner)), b1=nrm((ff_inner,)).reshape(1, ff_inner),
            w2=nrm((ff_inner, dim)), b2=nrm((dim,)).reshape(1, dim),
        )

    return dict(mbconv=mbconv, attn_block=attn_p(), ff_block=ff_p(),
                attn_grid=attn_p(), ff_grid=ff_p())


# ------------------------------------------------------------------------------ main
if __name__ == "__main__":
    n_heads, d_head, w = 2, 16, 2
    in_channels = n_heads * d_head        # forward requires x channels == inner_dim (32)
    B, H, W_ = 2, 8, 8

    key = jax.random.PRNGKey(0)
    kx, kp = jax.random.split(key)
    x = jax.random.normal(kx, (B, in_channels, H, W_), dtype=jnp.float32)
    params = init_params(kp, in_channels, n_heads, d_head, w)
    prep = prepare_params(params, heads=n_heads, dim_head=d_head, w=w)  # fold/cast once

    out = spatial_transformer_forward(x, prep, n_heads=n_heads, d_head=d_head, w=w)
    out = jax.block_until_ready(out)

    assert out.shape == (B, in_channels, H, W_), out.shape
    assert bool(jnp.all(jnp.isfinite(out)))
    print("KERNEL_OK")
</pallas_src>

<mosaic_0001>
module attributes {stable_mosaic.version = 11 : i64} {
  func.func @_mbconv_kernel(%arg0: i32, %arg1: memref<1x8x8x32xf32, #tpu.memory_space<vmem>>, %arg2: memref<32x128xbf16, #tpu.memory_space<vmem>>, %arg3: memref<1x128xf32, #tpu.memory_space<vmem>>, %arg4: memref<3x3x128xf32, #tpu.memory_space<vmem>>, %arg5: memref<1x128xf32, #tpu.memory_space<vmem>>, %arg6: memref<128x32xbf16, #tpu.memory_space<vmem>>, %arg7: memref<32x128xbf16, #tpu.memory_space<vmem>>, %arg8: memref<128x32xbf16, #tpu.memory_space<vmem>>, %arg9: memref<1x32xf32, #tpu.memory_space<vmem>>, %arg10: memref<1x8x8x32xf32, #tpu.memory_space<vmem>>, %arg11: memref<1x10x10x128xf32, #tpu.memory_space<vmem>>) attributes {dimension_semantics = [#tpu.dimension_semantics<parallel>], iteration_bounds = array<i64: 2>, scalar_prefetch = 0 : i64, scratch_operands = 1 : i64, tpu.core_type = #tpu.core_type<tc>, window_params = [{transform_indices = @transform_0, window_bounds = array<i64: 1, 8, 8, 32>}, {pipeline_mode = #tpu.pipeline_mode<synchronous>, transform_indices = @transform_1, window_bounds = array<i64: 32, 128>}, {pipeline_mode = #tpu.pipeline_mode<synchronous>, transform_indices = @transform_2, window_bounds = array<i64: 1, 128>}, {pipeline_mode = #tpu.pipeline_mode<synchronous>, transform_indices = @transform_3, window_bounds = array<i64: 3, 3, 128>}, {pipeline_mode = #tpu.pipeline_mode<synchronous>, transform_indices = @transform_4, window_bounds = array<i64: 1, 128>}, {pipeline_mode = #tpu.pipeline_mode<synchronous>, transform_indices = @transform_5, window_bounds = array<i64: 128, 32>}, {pipeline_mode = #tpu.pipeline_mode<synchronous>, transform_indices = @transform_6, window_bounds = array<i64: 32, 128>}, {pipeline_mode = #tpu.pipeline_mode<synchronous>, transform_indices = @transform_7, window_bounds = array<i64: 128, 32>}, {pipeline_mode = #tpu.pipeline_mode<synchronous>, transform_indices = @transform_8, window_bounds = array<i64: 1, 32>}, {transform_indices = @transform_9, window_bounds = array<i64: 1, 8, 8, 32>}]} {
    %c0 = arith.constant 0 : index
    %c0_0 = arith.constant 0 : index
    %c0_1 = arith.constant 0 : index
    %c0_2 = arith.constant 0 : index
    %0 = vector.load %arg1[%c0, %c0_0, %c0_1, %c0_2] : memref<1x8x8x32xf32, #tpu.memory_space<vmem>>, vector<1x8x8x32xf32>
    %1 = vector.shape_cast %0 : vector<1x8x8x32xf32> to vector<64x32xf32>
    %2 = arith.truncf %1 : vector<64x32xf32> to vector<64x32xbf16>
    %c0_3 = arith.constant 0 : index
    %c0_4 = arith.constant 0 : index
    %3 = vector.load %arg2[%c0_3, %c0_4] : memref<32x128xbf16, #tpu.memory_space<vmem>>, vector<32x128xbf16>
    %cst = arith.constant dense<0.000000e+00> : vector<64x128xf32>
    %4 = tpu.matmul %2, %3, %cst {dimension_numbers = #tpu.dot_dimension_numbers<[1], [0], [0], [1], [0, 0, 1, 1], [], []>} : vector<64x32xbf16>, vector<32x128xbf16>, vector<64x128xf32> -> vector<64x128xf32>
    %c0_5 = arith.constant 0 : index
    %c0_6 = arith.constant 0 : index
    %5 = vector.load %arg3[%c0_5, %c0_6] : memref<1x128xf32, #tpu.memory_space<vmem>>, vector<1x128xf32>
    %6 = vector.broadcast %5 : vector<1x128xf32> to vector<64x128xf32>
    %7 = arith.addf %4, %6 : vector<64x128xf32>
    %cst_7 = arith.constant 5.000000e-01 : f32
    %8 = vector.broadcast %cst_7 : f32 to vector<64x128xf32>
    %9 = arith.mulf %8, %7 : vector<64x128xf32>
    %cst_8 = arith.constant 4.471500e-02 : f32
    %10 = vector.broadcast %cst_8 : f32 to vector<64x128xf32>
    %11 = arith.mulf %10, %7 : vector<64x128xf32>
    %12 = arith.mulf %11, %7 : vector<64x128xf32>
    %13 = arith.mulf %12, %7 : vector<64x128xf32>
    %14 = arith.addf %7, %13 : vector<64x128xf32>
    %cst_9 = arith.constant 0.797884583 : f32
    %15 = vector.broadcast %cst_9 : f32 to vector<64x128xf32>
    %16 = arith.mulf %15, %14 : vector<64x128xf32>
    %17 = math.tanh %16 : vector<64x128xf32>
    %cst_10 = arith.constant 1.000000e+00 : f32
    %18 = vector.broadcast %cst_10 : f32 to vector<64x128xf32>
    %19 = arith.addf %18, %17 : vector<64x128xf32>
    %20 = arith.mulf %9, %19 : vector<64x128xf32>
    %c0_i32 = arith.constant 0 : i32
    %21 = arith.cmpi eq, %arg0, %c0_i32 : i32
    %22 = arith.extui %21 : i1 to i32
    %c0_i32_11 = arith.constant 0 : i32
    %23 = arith.cmpi ne, %22, %c0_i32_11 : i32
    scf.if %23 {
      %cst_48 = arith.constant 0.000000e+00 : f32
      %144 = vector.broadcast %cst_48 : f32 to vector<1x10x10x128xf32>
      %c0_49 = arith.constant 0 : index
      %c0_50 = arith.constant 0 : index
      %c0_51 = arith.constant 0 : index
      %c0_52 = arith.constant 0 : index
      %145 = vector.load %arg11[%c0_49, %c0_50, %c0_51, %c0_52] : memref<1x10x10x128xf32, #tpu.memory_space<vmem>>, vector<1x10x10x128xf32>
      tpu.vector_store %arg11[%c0_49, %c0_50, %c0_51, %c0_52], %144 {strides = array<i32>} : memref<1x10x10x128xf32, #tpu.memory_space<vmem>>, vector<1x10x10x128xf32>,
    } else {
    }
    %24 = vector.shape_cast %20 : vector<64x128xf32> to vector<1x8x8x128xf32>
    %c0_12 = arith.constant 0 : index
    %c1 = arith.constant 1 : index
    %c1_13 = arith.constant 1 : index
    %c0_14 = arith.constant 0 : index
    %25 = vector.load %arg11[%c0_12, %c1, %c1_13, %c0_14] : memref<1x10x10x128xf32, #tpu.memory_space<vmem>>, vector<1x8x8x128xf32>
    tpu.vector_store %arg11[%c0_12, %c1, %c1_13, %c0_14], %24 {strides = array<i32>} : memref<1x10x10x128xf32, #tpu.memory_space<vmem>>, vector<1x8x8x128xf32>,
    %c0_15 = arith.constant 0 : index
    %c0_16 = arith.constant 0 : index
    %c0_17 = arith.constant 0 : index
    %26 = vector.load %arg4[%c0_15, %c0_16, %c0_17] : memref<3x3x128xf32, #tpu.memory_space<vmem>>, vector<3x3x128xf32>
    %c0_18 = arith.constant 0 : index
    %c0_19 = arith.constant 0 : index
    %c0_20 = arith.constant 0 : index
    %c0_21 = arith.constant 0 : index
    %27 = vector.load %arg11[%c0_18, %c0_19, %c0_20, %c0_21] : memref<1x10x10x128xf32, #tpu.memory_space<vmem>>, vector<1x10x10x128xf32>
    %cst_22 = arith.constant 0.000000e+00 : f32
    %28 = vector.broadcast %cst_22 : f32 to vector<1x8x8x128xf32>
    %29 = vector.extract_strided_slice %27 {offsets = [0, 0, 0, 0], sizes = [1, 8, 8, 128], strides = [1, 1, 1, 1]} : vector<1x10x10x128xf32> to vector<1x8x8x128xf32>
    %30 = vector.extract_strided_slice %26 {offsets = [0, 0, 0], sizes = [1, 1, 128], strides = [1, 1, 1]} : vector<3x3x128xf32> to vector<1x1x128xf32>
    %31 = vector.shape_cast %30 : vector<1x1x128xf32> to vector<128xf32>
    %32 = vector.shape_cast %31 : vector<128xf32> to vector<1x1x1x128xf32>
    %33 = vector.broadcast %32 : vector<1x1x1x128xf32> to vector<1x8x8x128xf32>
    %34 = arith.mulf %29, %33 : vector<1x8x8x128xf32>
    %35 = arith.addf %28, %34 : vector<1x8x8x128xf32>
    %36 = vector.extract_strided_slice %27 {offsets = [0, 0, 1, 0], sizes = [1, 8, 8, 128], strides = [1, 1, 1, 1]} : vector<1x10x10x128xf32> to vector<1x8x8x128xf32>
    %37 = vector.extract_strided_slice %26 {offsets = [0, 1, 0], sizes = [1, 1, 128], strides = [1, 1, 1]} : vector<3x3x128xf32> to vector<1x1x128xf32>
    %38 = vector.shape_cast %37 : vector<1x1x128xf32> to vector<128xf32>
    %39 = vector.shape_cast %38 : vector<128xf32> to vector<1x1x1x128xf32>
    %40 = vector.broadcast %39 : vector<1x1x1x128xf32> to vector<1x8x8x128xf32>
    %41 = arith.mulf %36, %40 : vector<1x8x8x128xf32>
    %42 = arith.addf %35, %41 : vector<1x8x8x128xf32>
    %43 = vector.extract_strided_slice %27 {offsets = [0, 0, 2, 0], sizes = [1, 8, 8, 128], strides = [1, 1, 1, 1]} : vector<1x10x10x128xf32> to vector<1x8x8x128xf32>
    %44 = vector.extract_strided_slice %26 {offsets = [0, 2, 0], sizes = [1, 1, 128], strides = [1, 1, 1]} : vector<3x3x128xf32> to vector<1x1x128xf32>
    %45 = vector.shape_cast %44 : vector<1x1x128xf32> to vector<128xf32>
    %46 = vector.shape_cast %45 : vector<128xf32> to vector<1x1x1x128xf32>
    %47 = vector.broadcast %46 : vector<1x1x1x128xf32> to vector<1x8x8x128xf32>
    %48 = arith.mulf %43, %47 : vector<1x8x8x128xf32>
    %49 = arith.addf %42, %48 : vector<1x8x8x128xf32>
    %50 = vector.extract_strided_slice %27 {offsets = [0, 1, 0, 0], sizes = [1, 8, 8, 128], strides = [1, 1, 1, 1]} : vector<1x10x10x128xf32> to vector<1x8x8x128xf32>
    %51 = vector.extract_strided_slice %26 {offsets = [1, 0, 0], sizes = [1, 1, 128], strides = [1, 1, 1]} : vector<3x3x128xf32> to vector<1x1x128xf32>
    %52 = vector.shape_cast %51 : vector<1x1x128xf32> to vector<128xf32>
    %53 = vector.shape_cast %52 : vector<128xf32> to vector<1x1x1x128xf32>
    %54 = vector.broadcast %53 : vector<1x1x1x128xf32> to vector<1x8x8x128xf32>
    %55 = arith.mulf %50, %54 : vector<1x8x8x128xf32>
    %56 = arith.addf %49, %55 : vector<1x8x8x128xf32>
    %57 = vector.extract_strided_slice %27 {offsets = [0, 1, 1, 0], sizes = [1, 8, 8, 128], strides = [1, 1, 1, 1]} : vector<1x10x10x128xf32> to vector<1x8x8x128xf32>
    %58 = vector.extract_strided_slice %26 {offsets = [1, 1, 0], sizes = [1, 1, 128], strides = [1, 1, 1]} : vector<3x3x128xf32> to vector<1x1x128xf32>
    %59 = vector.shape_cast %58 : vector<1x1x128xf32> to vector<128xf32>
    %60 = vector.shape_cast %59 : vector<128xf32> to vector<1x1x1x128xf32>
    %61 = vector.broadcast %60 : vector<1x1x1x128xf32> to vector<1x8x8x128xf32>
    %62 = arith.mulf %57, %61 : vector<1x8x8x128xf32>
    %63 = arith.addf %56, %62 : vector<1x8x8x128xf32>
    %64 = vector.extract_strided_slice %27 {offsets = [0, 1, 2, 0], sizes = [1, 8, 8, 128], strides = [1, 1, 1, 1]} : vector<1x10x10x128xf32> to vector<1x8x8x128xf32>
    %65 = vector.extract_strided_slice %26 {offsets = [1, 2, 0], sizes = [1, 1, 128], strides = [1, 1, 1]} : vector<3x3x128xf32> to vector<1x1x128xf32>
    %66 = vector.shape_cast %65 : vector<1x1x128xf32> to vector<128xf32>
    %67 = vector.shape_cast %66 : vector<128xf32> to vector<1x1x1x128xf32>
    %68 = vector.broadcast %67 : vector<1x1x1x128xf32> to vector<1x8x8x128xf32>
    %69 = arith.mulf %64, %68 : vector<1x8x8x128xf32>
    %70 = arith.addf %63, %69 : vector<1x8x8x128xf32>
    %71 = vector.extract_strided_slice %27 {offsets = [0, 2, 0, 0], sizes = [1, 8, 8, 128], strides = [1, 1, 1, 1]} : vector<1x10x10x128xf32> to vector<1x8x8x128xf32>
    %72 = vector.extract_strided_slice %26 {offsets = [2, 0, 0], sizes = [1, 1, 128], strides = [1, 1, 1]} : vector<3x3x128xf32> to vector<1x1x128xf32>
    %73 = vector.shape_cast %72 : vector<1x1x128xf32> to vector<128xf32>
    %74 = vector.shape_cast %73 : vector<128xf32> to vector<1x1x1x128xf32>
    %75 = vector.broadcast %74 : vector<1x1x1x128xf32> to vector<1x8x8x128xf32>
    %76 = arith.mulf %71, %75 : vector<1x8x8x128xf32>
    %77 = arith.addf %70, %76 : vector<1x8x8x128xf32>
    %78 = vector.extract_strided_slice %27 {offsets = [0, 2, 1, 0], sizes = [1, 8, 8, 128], strides = [1, 1, 1, 1]} : vector<1x10x10x128xf32> to vector<1x8x8x128xf32>
    %79 = vector.extract_strided_slice %26 {offsets = [2, 1, 0], sizes = [1, 1, 128], strides = [1, 1, 1]} : vector<3x3x128xf32> to vector<1x1x128xf32>
    %80 = vector.shape_cast %79 : vector<1x1x128xf32> to vector<128xf32>
    %81 = vector.shape_cast %80 : vector<128xf32> to vector<1x1x1x128xf32>
    %82 = vector.broadcast %81 : vector<1x1x1x128xf32> to vector<1x8x8x128xf32>
    %83 = arith.mulf %78, %82 : vector<1x8x8x128xf32>
    %84 = arith.addf %77, %83 : vector<1x8x8x128xf32>
    %85 = vector.extract_strided_slice %27 {offsets = [0, 2, 2, 0], sizes = [1, 8, 8, 128], strides = [1, 1, 1, 1]} : vector<1x10x10x128xf32> to vector<1x8x8x128xf32>
    %86 = vector.extract_strided_slice %26 {offsets = [2, 2, 0], sizes = [1, 1, 128], strides = [1, 1, 1]} : vector<3x3x128xf32> to vector<1x1x128xf32>
    %87 = vector.shape_cast %86 : vector<1x1x128xf32> to vector<128xf32>
    %88 = vector.shape_cast %87 : vector<128xf32> to vector<1x1x1x128xf32>
    %89 = vector.broadcast %88 : vector<1x1x1x128xf32> to vector<1x8x8x128xf32>
    %90 = arith.mulf %85, %89 : vector<1x8x8x128xf32>
    %91 = arith.addf %84, %90 : vector<1x8x8x128xf32>
    %c0_23 = arith.constant 0 : index
    %c0_24 = arith.constant 0 : index
    %92 = vector.load %arg5[%c0_23, %c0_24] : memref<1x128xf32, #tpu.memory_space<vmem>>, vector<1x128xf32>
    %93 = vector.shape_cast %92 : vector<1x128xf32> to vector<128xf32>
    %94 = vector.shape_cast %93 : vector<128xf32> to vector<1x1x1x128xf32>
    %95 = vector.broadcast %94 : vector<1x1x1x128xf32> to vector<1x8x8x128xf32>
    %96 = arith.addf %91, %95 : vector<1x8x8x128xf32>
    %cst_25 = arith.constant 5.000000e-01 : f32
    %97 = vector.broadcast %cst_25 : f32 to vector<1x8x8x128xf32>
    %98 = arith.mulf %97, %96 : vector<1x8x8x128xf32>
    %cst_26 = arith.constant 4.471500e-02 : f32
    %99 = vector.broadcast %cst_26 : f32 to vector<1x8x8x128xf32>
    %100 = arith.mulf %99, %96 : vector<1x8x8x128xf32>
    %101 = arith.mulf %100, %96 : vector<1x8x8x128xf32>
    %102 = arith.mulf %101, %96 : vector<1x8x8x128xf32>
    %103 = arith.addf %96, %102 : vector<1x8x8x128xf32>
    %cst_27 = arith.constant 0.797884583 : f32
    %104 = vector.broadcast %cst_27 : f32 to vector<1x8x8x128xf32>
    %105 = arith.mulf %104, %103 : vector<1x8x8x128xf32>
    %106 = math.tanh %105 : vector<1x8x8x128xf32>
    %cst_28 = arith.constant 1.000000e+00 : f32
    %107 = vector.broadcast %cst_28 : f32 to vector<1x8x8x128xf32>
    %108 = arith.addf %107, %106 : vector<1x8x8x128xf32>
    %109 = arith.mulf %98, %108 : vector<1x8x8x128xf32>
    %110 = vector.shape_cast %109 : vector<1x8x8x128xf32> to vector<1x64x128xf32>
    %cst_29 = arith.constant dense<0.000000e+00> : vector<1x128xf32>
    %111 = vector.multi_reduction <add>, %110, %cst_29 [1] : vector<1x64x128xf32> to vector<1x128xf32>
    %cst_30 = arith.constant 6.400000e+01 : f32
    %112 = vector.broadcast %cst_30 : f32 to vector<1x128xf32>
    %113 = arith.divf %111, %112 : vector<1x128xf32>
    %114 = arith.truncf %113 : vector<1x128xf32> to vector<1x128xbf16>
    %c0_31 = arith.constant 0 : index
    %c0_32 = arith.constant 0 : index
    %115 = vector.load %arg6[%c0_31, %c0_32] : memref<128x32xbf16, #tpu.memory_space<vmem>>, vector<128x32xbf16>
    %cst_33 = arith.constant dense<0.000000e+00> : vector<1x32xf32>
    %116 = tpu.matmul %114, %115, %cst_33 {dimension_numbers = #tpu.dot_dimension_numbers<[1], [0], [0], [1], [0, 0, 1, 1], [], []>} : vector<1x128xbf16>, vector<128x32xbf16>, vector<1x32xf32> -> vector<1x32xf32>
    %117 = arith.negf %116 : vector<1x32xf32>
    %118 = math.exp %117 : vector<1x32xf32>
    %cst_34 = arith.constant 1.000000e+00 : f32
    %119 = vector.broadcast %cst_34 : f32 to vector<1x32xf32>
    %120 = arith.addf %119, %118 : vector<1x32xf32>
    %121 = arith.divf %119, %120 : vector<1x32xf32>
    %122 = arith.mulf %116, %121 : vector<1x32xf32>
    %123 = arith.truncf %122 : vector<1x32xf32> to vector<1x32xbf16>
    %c0_35 = arith.constant 0 : index
    %c0_36 = arith.constant 0 : index
    %124 = vector.load %arg7[%c0_35, %c0_36] : memref<32x128xbf16, #tpu.memory_space<vmem>>, vector<32x128xbf16>
    %cst_37 = arith.constant dense<0.000000e+00> : vector<1x128xf32>
    %125 = tpu.matmul %123, %124, %cst_37 {dimension_numbers = #tpu.dot_dimension_numbers<[1], [0], [0], [1], [0, 0, 1, 1], [], []>} : vector<1x32xbf16>, vector<32x128xbf16>, vector<1x128xf32> -> vector<1x128xf32>
    %126 = arith.negf %125 : vector<1x128xf32>
    %127 = math.exp %126 : vector<1x128xf32>
    %cst_38 = arith.constant 1.000000e+00 : f32
    %128 = vector.broadcast %cst_38 : f32 to vector<1x128xf32>
    %129 = arith.addf %128, %127 : vector<1x128xf32>
    %130 = arith.divf %128, %129 : vector<1x128xf32>
    %131 = vector.shape_cast %130 : vector<1x128xf32> to vector<1x1x1x128xf32>
    %132 = vector.broadcast %131 : vector<1x1x1x128xf32> to vector<1x8x8x128xf32>
    %133 = arith.mulf %109, %132 : vector<1x8x8x128xf32>
    %134 = vector.shape_cast %133 : vector<1x8x8x128xf32> to vector<64x128xf32>
    %135 = arith.truncf %134 : vector<64x128xf32> to vector<64x128xbf16>
    %c0_39 = arith.constant 0 : index
    %c0_40 = arith.constant 0 : index
    %136 = vector.load %arg8[%c0_39, %c0_40] : memref<128x32xbf16, #tpu.memory_space<vmem>>, vector<128x32xbf16>
    %cst_41 = arith.constant dense<0.000000e+00> : vector<64x32xf32>
    %137 = tpu.matmul %135, %136, %cst_41 {dimension_numbers = #tpu.dot_dimension_numbers<[1], [0], [0], [1], [0, 0, 1, 1], [], []>} : vector<64x128xbf16>, vector<128x32xbf16>, vector<64x32xf32> -> vector<64x32xf32>
    %c0_42 = arith.constant 0 : index
    %c0_43 = arith.constant 0 : index
    %138 = vector.load %arg9[%c0_42, %c0_43] : memref<1x32xf32, #tpu.memory_space<vmem>>, vector<1x32xf32>
    %139 = vector.broadcast %138 : vector<1x32xf32> to vector<64x32xf32>
    %140 = arith.addf %137, %139 : vector<64x32xf32>
    %141 = arith.addf %140, %1 : vector<64x32xf32>
    %142 = vector.shape_cast %141 : vector<64x32xf32> to vector<1x8x8x32xf32>
    %c0_44 = arith.constant 0 : index
    %c0_45 = arith.constant 0 : index
    %c0_46 = arith.constant 0 : index
    %c0_47 = arith.constant 0 : index
    %143 = vector.load %arg10[%c0_44, %c0_45, %c0_46, %c0_47] : memref<1x8x8x32xf32, #tpu.memory_space<vmem>>, vector<1x8x8x32xf32>
    tpu.vector_store %arg10[%c0_44, %c0_45, %c0_46, %c0_47], %142 {strides = array<i32>} : memref<1x8x8x32xf32, #tpu.memory_space<vmem>>, vector<1x8x8x32xf32>,
    return
  }
  func.func @transform_0(%arg0: i32) -> (i32, i32, i32, i32) {
    %c0_i32 = arith.constant 0 : i32
    %c0_i32_0 = arith.constant 0 : i32
    %c0_i32_1 = arith.constant 0 : i32
    %c0_i32_2 = arith.constant 0 : i32
    return %arg0, %c0_i32, %c0_i32_0, %c0_i32_1 : i32, i32, i32, i32
  }
  func.func @transform_1(%arg0: i32) -> (i32, i32) {
    %c0_i32 = arith.constant 0 : i32
    %c0_i32_0 = arith.constant 0 : i32
    %c0_i32_1 = arith.constant 0 : i32
    return %c0_i32, %c0_i32_0 : i32, i32
  }
  func.func @transform_2(%arg0: i32) -> (i32, i32) {
    %c0_i32 = arith.constant 0 : i32
    %c0_i32_0 = arith.constant 0 : i32
    %c0_i32_1 = arith.constant 0 : i32
    return %c0_i32, %c0_i32_0 : i32, i32
  }
  func.func @transform_3(%arg0: i32) -> (i32, i32, i32) {
    %c0_i32 = arith.constant 0 : i32
    %c0_i32_0 = arith.constant 0 : i32
    %c0_i32_1 = arith.constant 0 : i32
    %c0_i32_2 = arith.constant 0 : i32
    return %c0_i32, %c0_i32_0, %c0_i32_1 : i32, i32, i32
  }
  func.func @transform_4(%arg0: i32) -> (i32, i32) {
    %c0_i32 = arith.constant 0 : i32
    %c0_i32_0 = arith.constant 0 : i32
    %c0_i32_1 = arith.constant 0 : i32
    return %c0_i32, %c0_i32_0 : i32, i32
  }
  func.func @transform_5(%arg0: i32) -> (i32, i32) {
    %c0_i32 = arith.constant 0 : i32
    %c0_i32_0 = arith.constant 0 : i32
    %c0_i32_1 = arith.constant 0 : i32
    return %c0_i32, %c0_i32_0 : i32, i32
  }
  func.func @transform_6(%arg0: i32) -> (i32, i32) {
    %c0_i32 = arith.constant 0 : i32
    %c0_i32_0 = arith.constant 0 : i32
    %c0_i32_1 = arith.constant 0 : i32
    return %c0_i32, %c0_i32_0 : i32, i32
  }
  func.func @transform_7(%arg0: i32) -> (i32, i32) {
    %c0_i32 = arith.constant 0 : i32
    %c0_i32_0 = arith.constant 0 : i32
    %c0_i32_1 = arith.constant 0 : i32
    return %c0_i32, %c0_i32_0 : i32, i32
  }
  func.func @transform_8(%arg0: i32) -> (i32, i32) {
    %c0_i32 = arith.constant 0 : i32
    %c0_i32_0 = arith.constant 0 : i32
    %c0_i32_1 = arith.constant 0 : i32
    return %c0_i32, %c0_i32_0 : i32, i32
  }
  func.func @transform_9(%arg0: i32) -> (i32, i32, i32, i32) {
    %c0_i32 = arith.constant 0 : i32
    %c0_i32_0 = arith.constant 0 : i32
    %c0_i32_1 = arith.constant 0 : i32
    %c0_i32_2 = arith.constant 0 : i32
    return %arg0, %c0_i32, %c0_i32_0, %c0_i32_1 : i32, i32, i32, i32
  }
}

</mosaic_0001>

<bundles_post_ra>
// kernel: tpu_custom_call.1
= control target key start
LH: loop header
LB: loop body
LE: loop exit
PB: predicated region body
PF: predicated region fallthrough
CT: control target
= control target key end

     0   :  { %14 = vsyncpa [#allocation4], 0  ;;  %s2594_s0 = inlined_call_operand.vmem [shape: f32[2,8,8,32], index: 0, kind: input, shape index: {}]   ;;  %s2595_s1 = inlined_call_operand.vmem [shape: bf16[32,128], index: 1, kind: input, shape index: {}]   ;;  %s2596_s2 = inlined_call_operand.vmem [shape: f32[1,128], index: 2, kind: input, shape index: {}]   ;;  %s2597_s3 = inlined_call_operand.hbm [shape: f32[3,3,128], index: 3, kind: input, shape index: {}]   ;;  %s2598_s4 = inlined_call_operand.vmem [shape: f32[1,128], index: 4, kind: input, shape index: {}]   ;;  %s2599_s5 = inlined_call_operand.vmem [shape: bf16[128,32], index: 5, kind: input, shape index: {}]   ;;  %s2600_s6 = inlined_call_operand.hbm [shape: bf16[32,128], index: 6, kind: input, shape index: {}]   ;;  %s2601_s7 = inlined_call_operand.vmem [shape: bf16[128,32], index: 7, kind: input, shape index: {}]   ;;  %s2602_s8 = inlined_call_operand.vmem [shape: f32[1,32], index: 8, kind: input, shape index: {}]   ;;  %s2603_s9 = inlined_call_operand.hbm [shape: f32[2,8,8,32], index: 9, kind: output, shape index: {}]  }
   0x1   :  { %15 = vsyncpa [#allocation7], 0 }
   0x2   :  { %16 = vsyncpa [#allocation5], 0 }
   0x3   :  { %18 = vsyncpa [#allocation5 + $0x1], 0  ;;  %s1975_s30 = smov 0   ;;  %s1977_s10 = smov 0  }
   0x4   :  { %s1979_s11 = smov 0   ;;  %s1981_s12 = smov 0  }
   0x5 LB: > { %s1996_s13 = sadd.s32 4294967295, %s1915_s12   ;;  %s1540_s14 = sadd.s32 4294967294, %s1915_s12   ;;  %s1915_s12 = sphi %s1981_s12, %s2616_s12   ;;  %s1911_s11 = sphi %s1979_s11, %s2615_s11   ;;  %s1907_s10 = sphi %s1977_s10, %s2614_s10   ;;  %s1903_s30 = sphi %s1975_s30, %s2613_s30  }
   0x6   : > { %s2000_s15 = sadd.s32 1, %s1915_s12   ;;  %s225_s16 = sadd.s32 1, %s1911_s11 }
   0x7   : > { %s222_s17 = ssub.s32 %s1915_s12, %s2000_s15  ;;  %p235_p0 = scmp.ne.s32.totalorder %s1911_s11, %s1907_s10 }
   0x8   : > { %p223_p1 = scmp.eq.s32.totalorder %s222_s17, 0  ;;  %p236_p2 = scmp.eq.s32.totalorder %s1996_s13, 1 }
   0x9   : > { %p241_p3 = scmp.ne.s32.totalorder %s1907_s10, %s1903_s30  ;;  %p242_p4 = scmp.eq.s32.totalorder %s1540_s14, 1 }
   0xa   : > { %s2011_s18 = scalar_select %p223_p1, %s1911_s11, %s225_s16  }
   0xb   : > { %p2013_p5 = por %p236_p2, %p235_p0  ;;  %p2017_p6 = por %p242_p4, %p241_p3 }
   0xc   : > { %p1541_p7 = scmp.ge.s32.totalorder %s1915_s12, 1  ;;  %p249_p8 = scmp.lt.s32.totalorder %s1915_s12, 3 }
   0xd   : > { %p1542_p9 = scmp.ne.s32.totalorder %s1996_s13, 0  ;;  %p1695_p10 = scmp.eq.s32.totalorder %s1996_s13, 0 }
   0xe   : > { %p2025_p11 = pnand %p1541_p7, %p249_p8  ;;  %s266_s24 = sshll.u32 %s2597_s3, 4  ;;  %s267_s24 = int_to_ptr.hbm [resolvable:$true] %s266_s24 }
   0xf   : > { %s1917_s25 = smov [#allocation3]   ;;  %s286_s29 = sshll.u32 %s2600_s6, 4  ;;  %s287_s29 = int_to_ptr.hbm [resolvable:$true] %s286_s29 }
  0x10   : > { %p1684_p12 = pneg %p2025_p11  ;;  %s268_s26 = sshll.u32 %s1917_s25, 4  ;;  %s269_s26 = int_to_ptr.vmem [resolvable:$true] %s268_s26 }
  0x11   : > { %s1918_s14 = smov 64   ;;  %s1919_s16 = smov 4  }
  0x12   : > { %p1685_p13 = pnand %p1695_p10, %p1684_p12  ;;  %s1920_s17 = smov [#allocation6]  }
  0x13   : > { %s288_s22 = sshll.u32 %s1920_s17, 4  ;;  %318 = sbr.rel (%p2025_p11) target bundleno = 893 (0x37d), region = 56  ;;  %s289_s22 = int_to_ptr.vmem [resolvable:$true] %s288_s22 }
  0x14   : > { %1687 = dma.hbm_to_vmem [thread:$0]  (!%p1685_p13), %s267_s24, 192, %s269_s26, [#allocation4], %s1918_s14, %s1918_s14, %s1919_s16  }
  0x15   : > { %1690 = dma.hbm_to_vmem [thread:$0]  (!%p1685_p13), %s287_s29, 256, %s289_s22, [#allocation7], %s1918_s14, %s1918_s14, %s1919_s16  }
  0x18   : > { %1890 = dma.done.wait (%p1695_p10), [#allocation4], 192  }
  0x19   : > { %1892 = vsyncadd (%p1695_p10), [#allocation4], 4294967104 }
  0x1a   : > { %1894 = dma.done.wait (%p1695_p10), [#allocation7], 256  }
  0x1b   : > { %1896 = vsyncadd (%p1695_p10), [#allocation7], 4294967040  ;;  %s357_s23 = sand.u32 1, %s1907_s10   ;;  %p360_p0 = scmp.lt.s32.totalorder %s1996_s13, 1  ;;  %v1646_v0 = vld [vmem:[%s2595_s1 + $0x8] sm:$0xff]  ;;  %v1645_v1 = vld [vmem:[%s2595_s1] sm:$0xff] }
  0x1c   : > { %s2053_s21 = sshll.u32 %s357_s23, 6  ;;  %417 = vmatpush.bf16.msra.mxu0 %v1646_v0  ;;  %vm398_vm0 = vcmask 261120   ;;  %v2096_v14 = vld [vmem:[%s2596_s2] ss:$0 sm:$0xff] }
  0x1d   : > { %s361_s24 = scalar_select %p360_p0, %s1996_s13, 1 }
  0x1f   : > { %s1644_s25 = sshll.u32 %s361_s24, 6 }
  0x20   : > { %s364_s28 = scalar_lea.vmem %s2594_s0, %s1644_s25  ;;  %418 = vmatpush.bf16.msra.mxu0 %v1645_v1  ;;  %s2115_s25 = scalar_lea.vmem [#allocation8], %s2053_s21 }
  0x21   : > { %v2065_v2 = vld [vmem:[%s364_s28] sm:$0xff]  ;;  %v2067_v3 = vld [vmem:[%s364_s28 + $0x8] sm:$0xff]  ;;  %v2072_v5 = vld [vmem:[%s364_s28 + $0x10] sm:$0xff] }
  0x22   : > { %v374_v4 = vpack.c.bf16 %v2067_v3, %v2065_v2  ;;  %v2074_v6 = vld [vmem:[%s364_s28 + $0x18] sm:$0xff]  ;;  %v2079_v8 = vld [vmem:[%s364_s28 + $0x20] sm:$0xff]  ;;  %v2081_v9 = vld [vmem:[%s364_s28 + $0x28] sm:$0xff] }
  0x23   : > { %2609 = vst [vmem:[#allocation12_spill] sm:$0xff] %v2074_v6  ;;  %v375_v7 = vpack.c.bf16 %v2074_v6, %v2072_v5  ;;  %v376_v10 = vpack.c.bf16 %v2081_v9, %v2079_v8  ;;  %v2086_v11 = vld [vmem:[%s364_s28 + $0x30] sm:$0xff]  ;;  %v2088_v12 = vld [vmem:[%s364_s28 + $0x38] sm:$0xff] }
  0x24   : > { %1559 = vmatmul.msk.bf16.vlgmr.msra.gmra.mxu0 %vm398_vm0, %v374_v4  ;;  %2610 = vst [vmem:[#allocation13_spill] sm:$0xff] %v2088_v12  ;;  %v377_v13 = vpack.c.bf16 %v2088_v12, %v2086_v11 }
  0x34   : > { %1560 = vmatmul.msk.bf16.gmra.mxu0 %vm398_vm0, %v375_v7 }
  0x44   : > { %1561 = vmatmul.msk.bf16.gmra.mxu0 %vm398_vm0, %v376_v10 }
  0x54   : > { %1562 = vmatmul.msk.bf16.gmra.mxu0 %vm398_vm0, %v377_v13 }
  0xa1   : > { %v420_v15 = vpop.f32.mrf.mxu0 }
  0xa2   : > { %v421_v16 = vadd.f32 %v2096_v14, %v420_v15 }
  0xa4   : > { %v448_v17 = vmul.f32 0.044715, %v421_v16  ;;  %v440_v33 = vmul.f32 0.5, %v421_v16 }
  0xa6   : > { %v456_v18 = vmul.f32 %v448_v17, %v421_v16 }
  0xa8   : > { %v464_v19 = vmul.f32 %v456_v18, %v421_v16 }
  0xa9   : > { %v422_v20 = vpop.f32.mrf.mxu0 }
  0xaa   : > { %v472_v21 = vadd.f32 %v464_v19, %v421_v16  ;;  %v423_v22 = vadd.f32 %v2096_v14, %v422_v20 }
  0xac   : > { %v480_v23 = vmul.f32 0.7978846, %v472_v21  ;;  %v449_v24 = vmul.f32 0.044715, %v423_v22  ;;  %v441_v44 = vmul.f32 0.5, %v423_v22 }
  0xae   : > { %1741 = vtanh.f32 %v480_v23  ;;  %v457_v25 = vmul.f32 %v449_v24, %v423_v22 }
  0xb0   : > { %v465_v26 = vmul.f32 %v457_v25, %v423_v22 }
  0xb1   : > { %v425_v27 = vpop.f32.mrf.mxu0 }
  0xb2   : > { %v473_v28 = vadd.f32 %v465_v26, %v423_v22  ;;  %v426_v29 = vadd.f32 %v2096_v14, %v425_v27 }
  0xb4   : > { %v1742_v30 = vpop.eup %1741  ;;  %v481_v31 = vmul.f32 0.7978846, %v473_v28  ;;  %v450_v32 = vmul.f32 0.044715, %v426_v29  ;;  %v442_v55 = vmul.f32 0.5, %v426_v29 }
  0xb5   : > { %v496_v34 = vadd.f32 1.0, %v1742_v30 }
  0xb6   : > { %1743 = vtanh.f32 %v481_v31  ;;  %v458_v35 = vmul.f32 %v450_v32, %v426_v29 }
  0xb7   : > { %v2101_v36 = vmul.f32 %v496_v34, %v440_v33 }
  0xb8   : > { %v466_v37 = vmul.f32 %v458_v35, %v426_v29 }
  0xb9   : > { %v427_v38 = vpop.f32.mrf.mxu0 }
  0xba   : > { %v474_v39 = vadd.f32 %v466_v37, %v426_v29  ;;  %v428_v40 = vadd.f32 %v2096_v14, %v427_v38 }
  0xbc   : > { %v1744_v41 = vpop.eup %1743  ;;  %v482_v42 = vmul.f32 0.7978846, %v474_v39  ;;  %v451_v43 = vmul.f32 0.044715, %v428_v40  ;;  %v443_v4 = vmul.f32 0.5, %v428_v40 }
  0xbd   : > { %v497_v45 = vadd.f32 1.0, %v1744_v41 }
  0xbe   : > { %1745 = vtanh.f32 %v482_v42  ;;  %v459_v46 = vmul.f32 %v451_v43, %v428_v40 }
  0xbf   : > { %v2104_v47 = vmul.f32 %v497_v45, %v441_v44 }
  0xc0   : > { %v467_v48 = vmul.f32 %v459_v46, %v428_v40 }
  0xc1   : > { %v430_v49 = vpop.f32.mrf.mxu0 }
  0xc2   : > { %v475_v50 = vadd.f32 %v467_v48, %v428_v40  ;;  %v431_v51 = vadd.f32 %v2096_v14, %v430_v49 }
  0xc4   : > { %v1746_v52 = vpop.eup %1745  ;;  %v483_v53 = vmul.f32 0.7978846, %v475_v50  ;;  %v452_v54 = vmul.f32 0.044715, %v431_v51  ;;  %v444_v22 = vmul.f32 0.5, %v431_v51 }
  0xc5   : > { %v498_v56 = vadd.f32 1.0, %v1746_v52 }
  0xc6   : > { %1747 = vtanh.f32 %v483_v53  ;;  %v460_v57 = vmul.f32 %v452_v54, %v431_v51 }
  0xc7   : > { %v2107_v58 = vmul.f32 %v498_v56, %v442_v55 }
  0xc8   : > { %v468_v59 = vmul.f32 %v460_v57, %v431_v51 }
  0xc9   : > { %v432_v60 = vpop.f32.mrf.mxu0 }
  0xca   : > { %v476_v61 = vadd.f32 %v468_v59, %v431_v51  ;;  %v433_v62 = vadd.f32 %v2096_v14, %v432_v60 }
  0xcc   : > { %v1748_v63 = vpop.eup %1747  ;;  %v484_v0 = vmul.f32 0.7978846, %v476_v61  ;;  %v453_v1 = vmul.f32 0.044715, %v433_v62  ;;  %v445_v33 = vmul.f32 0.5, %v433_v62 }
  0xcd   : > { %v499_v7 = vadd.f32 1.0, %v1748_v63 }
  0xce   : > { %1749 = vtanh.f32 %v484_v0  ;;  %v461_v10 = vmul.f32 %v453_v1, %v433_v62 }
  0xcf   : > { %v2110_v13 = vmul.f32 %v499_v7, %v443_v4 }
  0xd0   : > { %v469_v15 = vmul.f32 %v461_v10, %v433_v62 }
  0xd1   : > { %v435_v16 = vpop.f32.mrf.mxu0 }
  0xd2   : > { %v477_v17 = vadd.f32 %v469_v15, %v433_v62  ;;  %v436_v18 = vadd.f32 %v2096_v14, %v435_v16 }
  0xd4   : > { %v1750_v19 = vpop.eup %1749  ;;  %v485_v20 = vmul.f32 0.7978846, %v477_v17  ;;  %v454_v21 = vmul.f32 0.044715, %v436_v18  ;;  %v446_v42 = vmul.f32 0.5, %v436_v18 }
  0xd5   : > { %v500_v23 = vadd.f32 1.0, %v1750_v19 }
  0xd6   : > { %1751 = vtanh.f32 %v485_v20  ;;  %v462_v24 = vmul.f32 %v454_v21, %v436_v18 }
  0xd7   : > { %v508_v25 = vmul.f32 %v500_v23, %v444_v22 }
  0xd8   : > { %v470_v26 = vmul.f32 %v462_v24, %v436_v18 }
  0xd9   : > { %v437_v27 = vpop.f32.mrf.mxu0 }
  0xda   : > { %v478_v28 = vadd.f32 %v470_v26, %v436_v18  ;;  %v438_v29 = vadd.f32 %v2096_v14, %v437_v27 }
  0xdc   : > { %v1752_v30 = vpop.eup %1751  ;;  %v486_v31 = vmul.f32 0.7978846, %v478_v28  ;;  %v455_v32 = vmul.f32 0.044715, %v438_v29  ;;  %v447_v46 = vmul.f32 0.5, %v438_v29 }
  0xdd   : > { %v501_v34 = vadd.f32 1.0, %v1752_v30 }
  0xde   : > { %1753 = vtanh.f32 %v486_v31  ;;  %v463_v35 = vmul.f32 %v455_v32, %v438_v29 }
  0xdf   : > { %v509_v37 = vmul.f32 %v501_v34, %v445_v33 }
  0xe0   : > { %v471_v38 = vmul.f32 %v463_v35, %v438_v29 }
  0xe2   : > { %v479_v39 = vadd.f32 %v471_v38, %v438_v29 }
  0xe4   : > { %v1754_v40 = vpop.eup %1753  ;;  %v487_v41 = vmul.f32 0.7978846, %v479_v39 }
  0xe5   : > { %v502_v43 = vadd.f32 1.0, %v1754_v40 }
  0xe6   : > { %1755 = vtanh.f32 %v487_v41 }
  0xe7   : > { %v510_v44 = vmul.f32 %v502_v43, %v446_v42 }
  0xeb   : > { %515 = sbr.rel (%p1542_p9) target bundleno = 261 (0x105), region = 68 }
  0xec   : > { %v1756_v45 = vpop.eup %1755 }
  0xed   : > { %v503_v14 = vadd.f32 1.0, %v1756_v45 }
  0xef   : > { %v511_v48 = vmul.f32 %v503_v14, %v447_v46 }
  0xf0   : > { %v1921_v49 = vmov 0.0  }
  0xf1   : > { %516 = vst [vmem:[#allocation2] sm:$0xff] %v1921_v49 }
  0xf2   : > { %517 = vst [vmem:[#allocation2 + $0x8] sm:$0x3] %v1921_v49 }
  0xf3   : > { %518 = vst [vmem:[#allocation2 + $0x10] sm:$0xff] %v1921_v49 }
  0xf4   : > { %519 = vst [vmem:[#allocation2 + $0x18] sm:$0x3] %v1921_v49 }
  0xf5   : > { %520 = vst [vmem:[#allocation2 + $0x20] sm:$0xff] %v1921_v49 }
  0xf6   : > { %521 = vst [vmem:[#allocation2 + $0x28] sm:$0x3] %v1921_v49 }
  0xf7   : > { %522 = vst [vmem:[#allocation2 + $0x30] sm:$0xff] %v1921_v49 }
  0xf8   : > { %523 = vst [vmem:[#allocation2 + $0x38] sm:$0x3] %v1921_v49 }
  0xf9   : > { %524 = vst [vmem:[#allocation2 + $0x40] sm:$0xff] %v1921_v49 }
  0xfa   : > { %525 = vst [vmem:[#allocation2 + $0x48] sm:$0x3] %v1921_v49 }
  0xfb   : > { %526 = vst [vmem:[#allocation2 + $0x50] sm:$0xff] %v1921_v49 }
  0xfc   : > { %527 = vst [vmem:[#allocation2 + $0x58] sm:$0x3] %v1921_v49 }
  0xfd   : > { %528 = vst [vmem:[#allocation2 + $0x60] sm:$0xff] %v1921_v49 }
  0xfe   : > { %529 = vst [vmem:[#allocation2 + $0x68] sm:$0x3] %v1921_v49 }
  0xff   : > { %530 = vst [vmem:[#allocation2 + $0x70] sm:$0xff] %v1921_v49 }
 0x100   : > { %531 = vst [vmem:[#allocation2 + $0x78] sm:$0x3] %v1921_v49 }
 0x101   : > { %532 = vst [vmem:[#allocation2 + $0x80] sm:$0xff] %v1921_v49 }
 0x102   : > { %533 = vst [vmem:[#allocation2 + $0x88] sm:$0x3] %v1921_v49 }
 0x103   : > { %534 = vst [vmem:[#allocation2 + $0x90] sm:$0xff] %v1921_v49 }
 0x104   : > { %535 = vst [vmem:[#allocation2 + $0x98] sm:$0x3] %v1921_v49 }
 0x105 PF: > { %v1654_v50 = vld [vmem:[%s2599_s5 + $0x38] sm:$0xff]  ;;  %537 = vst [vmem:[#allocation2 + $0x11] sm:$0xff] %v2101_v36  ;;  %v1653_v51 = vld [vmem:[%s2599_s5 + $0x30] sm:$0xff]  ;;  %v545_v52 = vld [vmem:[#allocation3] sm:$0x7]  ;;  %vm618_vm1 = vcmask 1046528  }
 0x106   : > { %538 = vst [vmem:[#allocation2 + $0x21] sm:$0xff] %v2104_v47  ;;  %1229 = vmatpush.bf16.msra.mxu1 %v1654_v50  ;;  %v2129_v53 = vld [vmem:[#allocation3 + $0x4] sm:$0x7]  ;;  %v549_v55 = vld [vmem:[#allocation2 + $0x8] sm:$0x3]  ;;  %v568_v47 = vperm.slane %v545_v52, 0 }
 0x107   : > { %539 = vst [vmem:[#allocation2 + $0x31] sm:$0xff] %v2107_v58  ;;  %v548_v54 = vld [vmem:[#allocation2] sm:$0xff]  ;;  %v1652_v36 = vld [vmem:[%s2599_s5 + $0x28] sm:$0xff]  ;;  %v585_v56 = vperm.slane %v545_v52, 1  ;;  %v2134_v57 = vperm.slane %v545_v52, 2  ;;  %v2137_v58 = vperm.slane %v2129_v53, 0 }
 0x108   : > { %540 = vst [vmem:[#allocation2 + $0x41] sm:$0xff] %v2110_v13  ;;  %v2140_v59 = vperm.slane %v2129_v53, 1  ;;  %v2146_v62 = vmul.f32 %v568_v47, %v548_v54  ;;  %v1651_v23 = vld [vmem:[%s2599_s5 + $0x20] sm:$0xff]  ;;  %v1650_v49 = vld [vmem:[%s2599_s5 + $0x18] sm:$0xff]  ;;  %vm692_vm2 = vcmask 1045504   ;;  %s1665_s16 = sshll.u32 %s1996_s13, 6 }
 0x109   : > { %541 = vst [vmem:[#allocation2 + $0x51] sm:$0xff] %v508_v25  ;;  %v586_v63 = vmul.f32 %v585_v56, %v548_v54  ;;  %v587_v0 = vmul.f32 %v585_v56, %v549_v55  ;;  %v2149_v1 = vmul.f32 %v2134_v57, %v548_v54  ;;  %v2161_v16 = vmul.f32 %v2134_v57, %v549_v55  ;;  %s1452_s24 = scalar_lea.hbm %s2603_s9, %s1665_s16  ;;  %s1453_s21 = sshll.u32 %s2115_s25, 4  ;;  %s1454_s21 = int_to_ptr.vmem [resolvable:$true] %s1453_s21 }
 0x10a   : > { %542 = vst [vmem:[#allocation2 + $0x61] sm:$0xff] %v509_v37  ;;  %1230 = vmatpush.bf16.msra.mxu1 %v1653_v51  ;;  %s1455_s13 = sshll.u32 %s1452_s24, 4  ;;  %s1441_s26 = scalar_lea.sflag [#allocation5], %s357_s23  ;;  %s1456_s13 = int_to_ptr.hbm [resolvable:$true] %s1455_s13 }
 0x10b   : > { %543 = vst [vmem:[#allocation2 + $0x71] sm:$0xff] %v510_v44  ;;  %v619_v22 = vrot.slane %v586_v63, 1  ;;  %v620_v29 = vrot.slane %v587_v0, 1  ;;  %s1859_s27 = sshra.s32 %s1456_s13, 4  ;;  %s1865_s16 = scalar_lea.hbm %s2603_s9, 128  ;;  %s1860_s27 = int_to_ptr.hbm [resolvable:$true] %s1859_s27 }
 0x10c   : > { %544 = vst [vmem:[#allocation2 + $0x81] sm:$0xff] %v511_v48  ;;  %v2142_v60 = vld [vmem:[#allocation2 + $0x10] sm:$0xff]  ;;  %v2144_v61 = vld [vmem:[#allocation2 + $0x18] sm:$0x3]  ;;  %s1861_s28 = scalar_lea.hbm %s1860_s27, 64  ;;  %p1866_p4 = scmp.lt.s32.totalorder %s1860_s27, %s2603_s9 }
 0x10d   : > { %v2151_v4 = vld [vmem:[#allocation2 + $0x20] sm:$0xff]  ;;  %v2153_v7 = vld [vmem:[#allocation2 + $0x28] sm:$0x3]  ;;  %v2156_v10 = vmul.f32 %v568_v47, %v2142_v60  ;;  %v588_v13 = vmul.f32 %v585_v56, %v2142_v60  ;;  %v589_v15 = vmul.f32 %v585_v56, %v2144_v61  ;;  %v621_v42 = vsel %vm618_vm1, %v619_v22, %v620_v29  ;;  %p1862_p1 = scmp.ne.s32.totalorder %s1860_s27, %s1861_s28  ;;  %p1867_p7 = scmp.lt.s32.totalorder %s1865_s16, %s1861_s28 }
 0x10e   : > { %v2163_v17 = vld [vmem:[#allocation2 + $0x30] sm:$0xff]  ;;  %v2165_v18 = vld [vmem:[#allocation2 + $0x38] sm:$0x3]  ;;  %v571_v19 = vmul.f32 %v568_v47, %v2151_v4  ;;  %v590_v20 = vmul.f32 %v585_v56, %v2151_v4  ;;  %v591_v21 = vmul.f32 %v585_v56, %v2153_v7  ;;  %1231 = vmatpush.bf16.msra.mxu1 %v1652_v36 }
 0x10f   : > { %v2173_v24 = vld [vmem:[#allocation2 + $0x40] sm:$0xff]  ;;  %v2175_v25 = vld [vmem:[#allocation2 + $0x48] sm:$0x3]  ;;  %v572_v26 = vmul.f32 %v568_v47, %v2163_v17  ;;  %v592_v27 = vmul.f32 %v585_v56, %v2163_v17  ;;  %v593_v28 = vmul.f32 %v585_v56, %v2165_v18  ;;  %v622_v35 = vrot.slane %v588_v13, 1  ;;  %p1863_p2 = pnand %p1862_p1, %p2013_p5  ;;  %p1868_p8 = por %p1867_p7, %p1866_p4 }
 0x110   : > { %v2180_v30 = vld [vmem:[#allocation2 + $0x50] sm:$0xff]  ;;  %v2182_v31 = vld [vmem:[#allocation2 + $0x58] sm:$0x3]  ;;  %v573_v32 = vmul.f32 %v568_v47, %v2173_v24  ;;  %v594_v33 = vmul.f32 %v585_v56, %v2173_v24  ;;  %v595_v34 = vmul.f32 %v585_v56, %v2175_v25  ;;  %v623_v48 = vrot.slane %v589_v15, 1 }
 0x111   : > { %v2187_v37 = vld [vmem:[#allocation2 + $0x60] sm:$0xff]  ;;  %v2189_v38 = vld [vmem:[#allocation2 + $0x68] sm:$0x3]  ;;  %v574_v39 = vmul.f32 %v568_v47, %v2180_v30  ;;  %v596_v40 = vmul.f32 %v585_v56, %v2180_v30  ;;  %v597_v41 = vmul.f32 %v585_v56, %v2182_v31  ;;  %v625_v54 = vrot.slane %v590_v20, 1  ;;  %p1864_p3 = pneg %p1863_p2 }
 0x112   : > { %v2195_v43 = vld [vmem:[#allocation2 + $0x70] sm:$0xff]  ;;  %v2197_v44 = vld [vmem:[#allocation2 + $0x78] sm:$0x3]  ;;  %v575_v45 = vmul.f32 %v568_v47, %v2187_v37  ;;  %v598_v46 = vmul.f32 %v585_v56, %v2187_v37  ;;  %v599_v14 = vmul.f32 %v585_v56, %v2189_v38  ;;  %1232 = vmatpush.bf16.msra.mxu1 %v1651_v23  ;;  %v624_v55 = vsel %vm618_vm1, %v622_v35, %v623_v48 }
 0x113   : > { %v576_v50 = vmul.f32 %v568_v47, %v2195_v43  ;;  %v600_v51 = vmul.f32 %v585_v56, %v2195_v43  ;;  %v601_v52 = vmul.f32 %v585_v56, %v2197_v44  ;;  %v626_v36 = vrot.slane %v591_v21, 1  ;;  %v1649_v56 = vld [vmem:[%s2599_s5 + $0x10] sm:$0xff]  ;;  %p1869_p9 = pnand %p1868_p8, %p1864_p3 }
 0x114   : > { %v628_v63 = vrot.slane %v592_v27, 1  ;;  %v629_v0 = vrot.slane %v593_v28, 1  ;;  %v631_v13 = vrot.slane %v594_v33, 1  ;;  %v632_v22 = vrot.slane %v595_v34, 1 }
 0x115   : > { %v634_v15 = vrot.slane %v596_v40, 1  ;;  %v635_v23 = vrot.slane %v597_v41, 1  ;;  %v627_v29 = vsel %vm618_vm1, %v625_v54, %v626_v36  ;;  %v637_v47 = vrot.slane %v598_v46, 1 }
 0x116   : > { %v630_v12 = vsel %vm618_vm1, %v628_v63, %v629_v0  ;;  %v638_v6 = vrot.slane %v599_v14, 1  ;;  %1233 = vmatpush.bf16.msra.mxu1 %v1650_v49  ;;  %v633_v20 = vsel %vm618_vm1, %v631_v13, %v632_v22  ;;  %v640_v27 = vrot.slane %v600_v51, 1 }
 0x117   : > { %v636_v21 = vsel %vm618_vm1, %v634_v15, %v635_v23  ;;  %v641_v28 = vrot.slane %v601_v52, 1  ;;  %v651_v34 = vadd.f32 %v621_v42, %v2146_v62  ;;  %v652_v35 = vadd.f32 %v624_v55, %v2156_v10  ;;  %v1647_v15 = vld [vmem:[%s2599_s5] sm:$0xff] }
 0x118   : > { %v639_v33 = vsel %vm618_vm1, %v637_v47, %v638_v6  ;;  %v653_v40 = vadd.f32 %v627_v29, %v571_v19  ;;  %v654_v46 = vadd.f32 %v630_v12, %v572_v26  ;;  %v655_v14 = vadd.f32 %v633_v20, %v573_v32  ;;  %v1648_v6 = vld [vmem:[%s2599_s5 + $0x8] sm:$0xff] }
 0x119   : > { %v642_v41 = vsel %vm618_vm1, %v640_v27, %v641_v28  ;;  %v656_v48 = vadd.f32 %v636_v21, %v574_v39  ;;  %v657_v49 = vadd.f32 %v639_v33, %v575_v45  ;;  %v662_v36 = vmul.f32 %v2134_v57, %v2142_v60 }
 0x11a   : > { %v658_v54 = vadd.f32 %v642_v41, %v576_v50  ;;  %v663_v51 = vmul.f32 %v2134_v57, %v2144_v61  ;;  %1234 = vmatpush.bf16.msra.mxu1 %v1649_v56  ;;  %v664_v62 = vmul.f32 %v2134_v57, %v2151_v4  ;;  %v665_v12 = vmul.f32 %v2134_v57, %v2153_v7 }
 0x11b   : > { %v666_v10 = vmul.f32 %v2134_v57, %v2163_v17  ;;  %v667_v19 = vmul.f32 %v2134_v57, %v2165_v18  ;;  %v668_v26 = vmul.f32 %v2134_v57, %v2173_v24  ;;  %v669_v32 = vmul.f32 %v2134_v57, %v2175_v25 }
 0x11c   : > { %v670_v39 = vmul.f32 %v2134_v57, %v2180_v30  ;;  %v671_v42 = vmul.f32 %v2134_v57, %v2182_v31  ;;  %v672_v45 = vmul.f32 %v2134_v57, %v2187_v37  ;;  %v673_v50 = vmul.f32 %v2134_v57, %v2189_v38 }
 0x11d   : > { %v674_v52 = vmul.f32 %v2134_v57, %v2195_v43  ;;  %v675_v55 = vmul.f32 %v2134_v57, %v2197_v44  ;;  %v693_v63 = vrot.slane %v2149_v1, 2  ;;  %v694_v0 = vrot.slane %v2161_v16, 2 }
 0x11e   : > { %v696_v13 = vrot.slane %v662_v36, 2  ;;  %v697_v22 = vrot.slane %v663_v51, 2  ;;  %1235 = vmatpush.bf16.msra.mxu1 %v1648_v6  ;;  %v699_v23 = vrot.slane %v664_v62, 2  ;;  %v700_v29 = vrot.slane %v665_v12, 2 }
 0x11f   : > { %v702_v47 = vrot.slane %v666_v10, 2  ;;  %v703_v56 = vrot.slane %v667_v19, 2  ;;  %v695_v20 = vsel %vm692_vm2, %v693_v63, %v694_v0  ;;  %v705_v57 = vrot.slane %v668_v26, 2  ;;  %v2262_v63 = vld [vmem:[#allocation2 + $0x80] sm:$0xff] }
 0x120   : > { %v698_v21 = vsel %vm692_vm2, %v696_v13, %v697_v22  ;;  %v706_v27 = vrot.slane %v669_v32, 2  ;;  %v701_v1 = vsel %vm692_vm2, %v699_v23, %v700_v29  ;;  %v708_v28 = vrot.slane %v670_v39, 2 }
 0x121   : > { %v704_v16 = vsel %vm692_vm2, %v702_v47, %v703_v56  ;;  %v709_v33 = vrot.slane %v671_v42, 2  ;;  %v711_v36 = vrot.slane %v672_v45, 2  ;;  %v712_v51 = vrot.slane %v673_v50, 2 }
 0x122   : > { %v707_v41 = vsel %vm692_vm2, %v705_v57, %v706_v27  ;;  %v714_v6 = vrot.slane %v674_v52, 2  ;;  %1236 = vmatpush.bf16.msra.mxu1 %v1647_v15  ;;  %v715_v12 = vrot.slane %v675_v55, 2  ;;  %v725_v10 = vadd.f32 %v695_v20, %v651_v34  ;;  %v2282_v20 = vld [vmem:[#allocation2 + $0x88] sm:$0x3] }
 0x123   : > { %v710_v62 = vsel %vm692_vm2, %v708_v28, %v709_v33  ;;  %v726_v19 = vadd.f32 %v698_v21, %v652_v35  ;;  %v713_v26 = vsel %vm692_vm2, %v711_v36, %v712_v51  ;;  %v727_v32 = vadd.f32 %v701_v1, %v653_v40 }
 0x124   : > { %v728_v0 = vadd.f32 %v704_v16, %v654_v46  ;;  %v729_v13 = vadd.f32 %v707_v41, %v655_v14  ;;  %v716_v39 = vsel %vm692_vm2, %v714_v6, %v715_v12  ;;  %v730_v42 = vadd.f32 %v710_v62, %v656_v48 }
 0x125   : > { %v731_v22 = vadd.f32 %v713_v26, %v657_v49  ;;  %v734_v45 = vmul.f32 %v2137_v58, %v2142_v60  ;;  %v732_v50 = vadd.f32 %v716_v39, %v658_v54  ;;  %v735_v52 = vmul.f32 %v2137_v58, %v2151_v4 }
 0x126   : > { %v736_v34 = vmul.f32 %v2137_v58, %v2163_v17  ;;  %v737_v35 = vmul.f32 %v2137_v58, %v2173_v24  ;;  %v738_v40 = vmul.f32 %v2137_v58, %v2180_v30  ;;  %v739_v46 = vmul.f32 %v2137_v58, %v2187_v37 }
 0x127   : > { %v740_v14 = vmul.f32 %v2137_v58, %v2195_v43  ;;  %v741_v48 = vmul.f32 %v2137_v58, %v2262_v63  ;;  %v742_v49 = vadd.f32 %v734_v45, %v725_v10  ;;  %v743_v54 = vadd.f32 %v735_v52, %v726_v19 }
 0x128   : > { %v744_v55 = vadd.f32 %v736_v34, %v727_v32  ;;  %v745_v15 = vadd.f32 %v737_v35, %v728_v0  ;;  %v746_v23 = vadd.f32 %v738_v40, %v729_v13  ;;  %v747_v29 = vadd.f32 %v739_v46, %v730_v42 }
 0x129   : > { %v748_v47 = vadd.f32 %v740_v14, %v731_v22  ;;  %v749_v56 = vadd.f32 %v741_v48, %v732_v50  ;;  %v751_v21 = vmul.f32 %v2140_v59, %v2142_v60  ;;  %v752_v57 = vmul.f32 %v2140_v59, %v2144_v61 }
 0x12a   : > { %v753_v27 = vmul.f32 %v2140_v59, %v2151_v4  ;;  %v754_v58 = vmul.f32 %v2140_v59, %v2153_v7  ;;  %v755_v1 = vmul.f32 %v2140_v59, %v2163_v17  ;;  %v756_v16 = vmul.f32 %v2140_v59, %v2165_v18 }
 0x12b   : > { %v757_v28 = vmul.f32 %v2140_v59, %v2173_v24  ;;  %v758_v33 = vmul.f32 %v2140_v59, %v2175_v25  ;;  %v759_v41 = vmul.f32 %v2140_v59, %v2180_v30  ;;  %v760_v36 = vmul.f32 %v2140_v59, %v2182_v31 }
 0x12c   : > { %v761_v51 = vmul.f32 %v2140_v59, %v2187_v37  ;;  %v762_v6 = vmul.f32 %v2140_v59, %v2189_v38  ;;  %v763_v62 = vmul.f32 %v2140_v59, %v2195_v43  ;;  %v764_v12 = vmul.f32 %v2140_v59, %v2197_v44 }
 0x12d   : > { %v765_v10 = vmul.f32 %v2140_v59, %v2262_v63  ;;  %v766_v19 = vmul.f32 %v2140_v59, %v2282_v20  ;;  %v783_v26 = vrot.slane %v751_v21, 1  ;;  %v784_v32 = vrot.slane %v752_v57, 1 }
 0x12e   : > { %v786_v0 = vrot.slane %v753_v27, 1  ;;  %v787_v13 = vrot.slane %v754_v58, 1  ;;  %v789_v39 = vrot.slane %v755_v1, 1  ;;  %v790_v42 = vrot.slane %v756_v16, 1  ;;  %v547_v58 = vld [vmem:[#allocation3 + $0x8] sm:$0x7] }
 0x12f   : > { %v792_v22 = vrot.slane %v757_v28, 1  ;;  %v793_v45 = vrot.slane %v758_v33, 1  ;;  %v785_v50 = vsel %vm618_vm1, %v783_v26, %v784_v32  ;;  %v795_v34 = vrot.slane %v759_v41, 1 }
 0x130   : > { %v788_v52 = vsel %vm618_vm1, %v786_v0, %v787_v13  ;;  %v796_v35 = vrot.slane %v760_v36, 1  ;;  %v791_v40 = vsel %vm618_vm1, %v789_v39, %v790_v42  ;;  %v798_v14 = vrot.slane %v761_v51, 1 }
 0x131   : > { %v794_v46 = vsel %vm618_vm1, %v792_v22, %v793_v45  ;;  %v799_v59 = vrot.slane %v762_v6, 1  ;;  %v801_v21 = vrot.slane %v763_v62, 1  ;;  %v802_v57 = vrot.slane %v764_v12, 1 }
 0x132   : > { %v797_v48 = vsel %vm618_vm1, %v795_v34, %v796_v35  ;;  %v804_v27 = vrot.slane %v765_v10, 1  ;;  %v805_v16 = vrot.slane %v766_v19, 1  ;;  %v815_v28 = vadd.f32 %v785_v50, %v742_v49 }
 0x133   : > { %v800_v1 = vsel %vm618_vm1, %v798_v14, %v799_v59  ;;  %v816_v33 = vadd.f32 %v788_v52, %v743_v54  ;;  %v803_v41 = vsel %vm618_vm1, %v801_v21, %v802_v57  ;;  %v817_v36 = vadd.f32 %v791_v40, %v744_v55 }
 0x134   : > { %v818_v26 = vadd.f32 %v794_v46, %v745_v15  ;;  %v819_v32 = vadd.f32 %v797_v48, %v746_v23  ;;  %v806_v0 = vsel %vm618_vm1, %v804_v27, %v805_v16  ;;  %v820_v51 = vadd.f32 %v800_v1, %v747_v29 }
 0x135   : > { %v821_v6 = vadd.f32 %v803_v41, %v748_v47  ;;  %v823_v13 = vperm.slane %v2129_v53, 2  ;;  %v822_v62 = vadd.f32 %v806_v0, %v749_v56  ;;  %v896_v12 = vperm.slane %v547_v58, 0 }
 0x136   : > { %v2325_v10 = vperm.slane %v547_v58, 1  ;;  %v2327_v39 = vperm.slane %v547_v58, 2 }
 0x137   : > { %v824_v49 = vmul.f32 %v823_v13, %v2142_v60  ;;  %v825_v54 = vmul.f32 %v823_v13, %v2144_v61  ;;  %v826_v55 = vmul.f32 %v823_v13, %v2151_v4  ;;  %v827_v15 = vmul.f32 %v823_v13, %v2153_v7 }
 0x138   : > { %v828_v23 = vmul.f32 %v823_v13, %v2163_v17  ;;  %v829_v29 = vmul.f32 %v823_v13, %v2165_v18  ;;  %v830_v53 = vmul.f32 %v823_v13, %v2173_v24  ;;  %v831_v47 = vmul.f32 %v823_v13, %v2175_v25 }
 0x139   : > { %v832_v56 = vmul.f32 %v823_v13, %v2180_v30  ;;  %v833_v19 = vmul.f32 %v823_v13, %v2182_v31  ;;  %v834_v60 = vmul.f32 %v823_v13, %v2187_v37  ;;  %v835_v61 = vmul.f32 %v823_v13, %v2189_v38 }
 0x13a   : > { %v836_v42 = vmul.f32 %v823_v13, %v2195_v43  ;;  %v837_v22 = vmul.f32 %v823_v13, %v2197_v44  ;;  %v838_v45 = vmul.f32 %v823_v13, %v2262_v63  ;;  %v839_v50 = vmul.f32 %v823_v13, %v2282_v20 }
 0x13b   : > { %v856_v52 = vrot.slane %v824_v49, 2  ;;  %v857_v34 = vrot.slane %v825_v54, 2  ;;  %v859_v35 = vrot.slane %v826_v55, 2  ;;  %v860_v40 = vrot.slane %v827_v15, 2 }
 0x13c   : > { %v862_v46 = vrot.slane %v828_v23, 2  ;;  %v863_v14 = vrot.slane %v829_v29, 2  ;;  %v865_v59 = vrot.slane %v830_v53, 2  ;;  %v866_v48 = vrot.slane %v831_v47, 2  ;;  %v2351_v47 = vld [vmem:[#allocation2 + $0x90] sm:$0xff] }
 0x13d   : > { %v858_v21 = vsel %vm692_vm2, %v856_v52, %v857_v34  ;;  %v861_v57 = vsel %vm692_vm2, %v859_v35, %v860_v40  ;;  %v868_v27 = vrot.slane %v832_v56, 2  ;;  %v869_v58 = vrot.slane %v833_v19, 2 }
 0x13e   : > { %v864_v1 = vsel %vm692_vm2, %v862_v46, %v863_v14  ;;  %v867_v16 = vsel %vm692_vm2, %v865_v59, %v866_v48  ;;  %v871_v41 = vrot.slane %v834_v60, 2  ;;  %v872_v0 = vrot.slane %v835_v61, 2 }
 0x13f   : > { %v870_v13 = vsel %vm692_vm2, %v868_v27, %v869_v58  ;;  %v874_v49 = vrot.slane %v836_v42, 2  ;;  %v875_v54 = vrot.slane %v837_v22, 2  ;;  %v877_v55 = vrot.slane %v838_v45, 2 }
 0x140   : > { %v873_v15 = vsel %vm692_vm2, %v871_v41, %v872_v0  ;;  %v878_v23 = vrot.slane %v839_v50, 2  ;;  %v888_v29 = vadd.f32 %v858_v21, %v815_v28  ;;  %v889_v53 = vadd.f32 %v861_v57, %v816_v33  ;;  %v2363_v21 = vld [vmem:[#allocation2 + $0x98] sm:$0x3] }
 0x141   : > { %v876_v56 = vsel %vm692_vm2, %v874_v49, %v875_v54  ;;  %v890_v19 = vadd.f32 %v864_v1, %v817_v36  ;;  %v891_v52 = vadd.f32 %v867_v16, %v818_v26  ;;  %v892_v34 = vadd.f32 %v870_v13, %v819_v32 }
 0x142   : > { %v879_v60 = vsel %vm692_vm2, %v877_v55, %v878_v23  ;;  %v893_v61 = vadd.f32 %v873_v15, %v820_v51  ;;  %v894_v35 = vadd.f32 %v876_v56, %v821_v6  ;;  %v897_v42 = vmul.f32 %v896_v12, %v2151_v4 }
 0x143   : > { %v895_v22 = vadd.f32 %v879_v60, %v822_v62  ;;  %v898_v45 = vmul.f32 %v896_v12, %v2163_v17  ;;  %v899_v50 = vmul.f32 %v896_v12, %v2173_v24  ;;  %v900_v28 = vmul.f32 %v896_v12, %v2180_v30 }
 0x144   : > { %v901_v33 = vmul.f32 %v896_v12, %v2187_v37  ;;  %v902_v40 = vmul.f32 %v896_v12, %v2195_v43  ;;  %v903_v36 = vmul.f32 %v896_v12, %v2262_v63  ;;  %v904_v26 = vmul.f32 %v896_v12, %v2351_v47 }
 0x145   : > { %v905_v32 = vadd.f32 %v897_v42, %v888_v29  ;;  %v906_v51 = vadd.f32 %v898_v45, %v889_v53  ;;  %v907_v6 = vadd.f32 %v899_v50, %v890_v19  ;;  %v908_v46 = vadd.f32 %v900_v28, %v891_v52 }
 0x146   : > { %v909_v14 = vadd.f32 %v901_v33, %v892_v34  ;;  %v910_v62 = vadd.f32 %v902_v40, %v893_v61  ;;  %v911_v59 = vadd.f32 %v903_v36, %v894_v35  ;;  %v912_v48 = vadd.f32 %v904_v26, %v895_v22 }
 0x147   : > { %v914_v57 = vmul.f32 %v2325_v10, %v2151_v4  ;;  %v915_v27 = vmul.f32 %v2325_v10, %v2153_v7  ;;  %v916_v58 = vmul.f32 %v2325_v10, %v2163_v17  ;;  %v917_v12 = vmul.f32 %v2325_v10, %v2165_v18 }
 0x148   : > { %v918_v1 = vmul.f32 %v2325_v10, %v2173_v24  ;;  %v919_v16 = vmul.f32 %v2325_v10, %v2175_v25  ;;  %v920_v41 = vmul.f32 %v2325_v10, %v2180_v30  ;;  %v921_v0 = vmul.f32 %v2325_v10, %v2182_v31 }
 0x149   : > { %v922_v13 = vmul.f32 %v2325_v10, %v2187_v37  ;;  %v923_v49 = vmul.f32 %v2325_v10, %v2189_v38  ;;  %v924_v54 = vmul.f32 %v2325_v10, %v2195_v43  ;;  %v925_v55 = vmul.f32 %v2325_v10, %v2197_v44 }
 0x14a   : > { %v926_v15 = vmul.f32 %v2325_v10, %v2262_v63  ;;  %v927_v23 = vmul.f32 %v2325_v10, %v2282_v20  ;;  %v928_v29 = vmul.f32 %v2325_v10, %v2351_v47  ;;  %v929_v53 = vmul.f32 %v2325_v10, %v2363_v21 }
 0x14b   : > { %v946_v56 = vrot.slane %v914_v57, 1  ;;  %v947_v19 = vrot.slane %v915_v27, 1  ;;  %v949_v52 = vrot.slane %v916_v58, 1  ;;  %v950_v34 = vrot.slane %v917_v12, 1 }
 0x14c   : > { %v952_v60 = vrot.slane %v918_v1, 1  ;;  %v953_v61 = vrot.slane %v919_v16, 1  ;;  %v955_v35 = vrot.slane %v920_v41, 1  ;;  %v956_v42 = vrot.slane %v921_v0, 1 }
 0x14d   : > { %v948_v22 = vsel %vm618_vm1, %v946_v56, %v947_v19  ;;  %v951_v45 = vsel %vm618_vm1, %v949_v52, %v950_v34  ;;  %v958_v50 = vrot.slane %v922_v13, 1  ;;  %v959_v28 = vrot.slane %v923_v49, 1 }
 0x14e   : > { %v954_v33 = vsel %vm618_vm1, %v952_v60, %v953_v61  ;;  %v957_v40 = vsel %vm618_vm1, %v955_v35, %v956_v42  ;;  %v961_v36 = vrot.slane %v924_v54, 1  ;;  %v962_v10 = vrot.slane %v925_v55, 1 }
 0x14f   : > { %v960_v26 = vsel %vm618_vm1, %v958_v50, %v959_v28  ;;  %v964_v57 = vrot.slane %v926_v15, 1  ;;  %v965_v27 = vrot.slane %v927_v23, 1  ;;  %v967_v58 = vrot.slane %v928_v29, 1 }
 0x150   : > { %v963_v12 = vsel %vm618_vm1, %v961_v36, %v962_v10  ;;  %v968_v1 = vrot.slane %v929_v53, 1  ;;  %v978_v16 = vadd.f32 %v948_v22, %v905_v32  ;;  %v979_v41 = vadd.f32 %v951_v45, %v906_v51 }
 0x151   : > { %v966_v0 = vsel %vm618_vm1, %v964_v57, %v965_v27  ;;  %v980_v13 = vadd.f32 %v954_v33, %v907_v6  ;;  %v981_v49 = vadd.f32 %v957_v40, %v908_v46  ;;  %v982_v56 = vadd.f32 %v960_v26, %v909_v14 }
 0x152   : > { %v969_v19 = vsel %vm618_vm1, %v967_v58, %v968_v1  ;;  %v983_v52 = vadd.f32 %v963_v12, %v910_v62  ;;  %v984_v54 = vadd.f32 %v966_v0, %v911_v59  ;;  %v987_v55 = vmul.f32 %v2327_v39, %v2151_v4 }
 0x153   : > { %v985_v15 = vadd.f32 %v969_v19, %v912_v48  ;;  %v988_v23 = vmul.f32 %v2327_v39, %v2153_v7  ;;  %v989_v32 = vmul.f32 %v2327_v39, %v2163_v17  ;;  %v990_v51 = vmul.f32 %v2327_v39, %v2165_v18 }
 0x154   : > { %v991_v6 = vmul.f32 %v2327_v39, %v2173_v24  ;;  %v992_v46 = vmul.f32 %v2327_v39, %v2175_v25  ;;  %v993_v14 = vmul.f32 %v2327_v39, %v2180_v30  ;;  %v994_v4 = vmul.f32 %v2327_v39, %v2182_v31 }
 0x155   : > { %v995_v7 = vmul.f32 %v2327_v39, %v2187_v37  ;;  %v996_v17 = vmul.f32 %v2327_v39, %v2189_v38  ;;  %v997_v18 = vmul.f32 %v2327_v39, %v2195_v43  ;;  %v998_v24 = vmul.f32 %v2327_v39, %v2197_v44 }
 0x156   : > { %v999_v25 = vmul.f32 %v2327_v39, %v2262_v63  ;;  %v1000_v30 = vmul.f32 %v2327_v39, %v2282_v20  ;;  %v1001_v31 = vmul.f32 %v2327_v39, %v2351_v47  ;;  %v1002_v37 = vmul.f32 %v2327_v39, %v2363_v21  ;;  %v1757_v21 = vld [vmem:[%s2598_s4] ss:$0 sm:$0xff] }
 0x157   : > { %v1019_v62 = vrot.slane %v987_v55, 2  ;;  %v1020_v38 = vrot.slane %v988_v23, 2  ;;  %v1022_v59 = vrot.slane %v989_v32, 2  ;;  %v1023_v48 = vrot.slane %v990_v51, 2 }
 0x158   : > { %v1025_v43 = vrot.slane %v991_v6, 2  ;;  %v1026_v29 = vrot.slane %v992_v46, 2  ;;  %v1028_v53 = vrot.slane %v993_v14, 2  ;;  %v1029_v44 = vrot.slane %v994_v4, 2 }
 0x159   : > { %v1021_v34 = vsel %vm692_vm2, %v1019_v62, %v1020_v38  ;;  %v1024_v63 = vsel %vm692_vm2, %v1022_v59, %v1023_v48  ;;  %v1031_v60 = vrot.slane %v995_v7, 2  ;;  %v1032_v20 = vrot.slane %v996_v17, 2 }
 0x15a   : > { %v1027_v61 = vsel %vm692_vm2, %v1025_v43, %v1026_v29  ;;  %v1030_v47 = vsel %vm692_vm2, %v1028_v53, %v1029_v44  ;;  %v1034_v35 = vrot.slane %v997_v18, 2  ;;  %v1035_v39 = vrot.slane %v998_v24, 2 }
 0x15b   : > { %v1033_v42 = vsel %vm692_vm2, %v1031_v60, %v1032_v20  ;;  %v1037_v22 = vrot.slane %v999_v25, 2  ;;  %v1038_v45 = vrot.slane %v1000_v30, 2  ;;  %v1040_v50 = vrot.slane %v1001_v31, 2 }
 0x15c   : > { %v1036_v28 = vsel %vm692_vm2, %v1034_v35, %v1035_v39  ;;  %v1041_v33 = vrot.slane %v1002_v37, 2  ;;  %v1051_v40 = vadd.f32 %v1021_v34, %v978_v16  ;;  %v1052_v36 = vadd.f32 %v1024_v63, %v979_v41 }
 0x15d   : > { %v1039_v10 = vsel %vm692_vm2, %v1037_v22, %v1038_v45  ;;  %v1053_v26 = vadd.f32 %v1027_v61, %v980_v13  ;;  %v1054_v57 = vadd.f32 %v1030_v47, %v981_v49  ;;  %v1055_v27 = vadd.f32 %v1033_v42, %v982_v56 }
 0x15e   : > { %v1042_v58 = vsel %vm692_vm2, %v1040_v50, %v1041_v33  ;;  %v1056_v12 = vadd.f32 %v1036_v28, %v983_v52  ;;  %v1057_v1 = vadd.f32 %v1039_v10, %v984_v54  ;;  %v1063_v0 = vadd.f32 %v1757_v21, %v1051_v40 }
 0x15f   : > { %v1058_v19 = vadd.f32 %v1042_v58, %v985_v15  ;;  %v1064_v55 = vadd.f32 %v1757_v21, %v1052_v36  ;;  %v1065_v23 = vadd.f32 %v1757_v21, %v1053_v26  ;;  %v1066_v32 = vadd.f32 %v1757_v21, %v1054_v57 }
 0x160   : > { %v2448_v51 = vadd.f32 %v1757_v21, %v1055_v27  ;;  %v2450_v6 = vadd.f32 %v1757_v21, %v1056_v12  ;;  %v2452_v16 = vadd.f32 %v1757_v21, %v1057_v1  ;;  %v1079_v13 = vmul.f32 0.044715, %v1063_v0 }
 0x161   : > { %v2454_v41 = vadd.f32 %v1757_v21, %v1058_v19  ;;  %v1080_v49 = vmul.f32 0.044715, %v1064_v55  ;;  %v1081_v56 = vmul.f32 0.044715, %v1065_v23  ;;  %v1082_v46 = vmul.f32 0.044715, %v1066_v32 }
 0x162   : > { %v1083_v52 = vmul.f32 0.044715, %v2448_v51  ;;  %v1084_v54 = vmul.f32 0.044715, %v2450_v6  ;;  %v1087_v15 = vmul.f32 %v1079_v13, %v1063_v0  ;;  %v1085_v14 = vmul.f32 0.044715, %v2452_v16 }
 0x163   : > { %v1086_v4 = vmul.f32 0.044715, %v2454_v41  ;;  %v1088_v7 = vmul.f32 %v1080_v49, %v1064_v55  ;;  %v1089_v17 = vmul.f32 %v1081_v56, %v1065_v23  ;;  %v1090_v18 = vmul.f32 %v1082_v46, %v1066_v32 }
 0x164   : > { %v1091_v24 = vmul.f32 %v1083_v52, %v2448_v51  ;;  %v1092_v25 = vmul.f32 %v1084_v54, %v2450_v6  ;;  %v1095_v30 = vmul.f32 %v1087_v15, %v1063_v0  ;;  %v1093_v31 = vmul.f32 %v1085_v14, %v2452_v16 }
 0x165   : > { %v1094_v37 = vmul.f32 %v1086_v4, %v2454_v41  ;;  %v1096_v62 = vmul.f32 %v1088_v7, %v1064_v55  ;;  %v1097_v38 = vmul.f32 %v1089_v17, %v1065_v23  ;;  %v1098_v59 = vmul.f32 %v1090_v18, %v1066_v32 }
 0x166   : > { %v1099_v48 = vmul.f32 %v1091_v24, %v2448_v51  ;;  %v1100_v43 = vmul.f32 %v1092_v25, %v2450_v6  ;;  %v1103_v29 = vadd.f32 %v1095_v30, %v1063_v0  ;;  %v1101_v53 = vmul.f32 %v1093_v31, %v2452_v16 }
 0x167   : > { %v1102_v44 = vmul.f32 %v1094_v37, %v2454_v41  ;;  %v1104_v34 = vadd.f32 %v1096_v62, %v1064_v55  ;;  %v1105_v63 = vadd.f32 %v1097_v38, %v1065_v23  ;;  %v1106_v60 = vadd.f32 %v1098_v59, %v1066_v32 }
 0x168   : > { %v1107_v20 = vadd.f32 %v1099_v48, %v2448_v51  ;;  %v1108_v61 = vadd.f32 %v1100_v43, %v2450_v6  ;;  %v1111_v47 = vmul.f32 0.7978846, %v1103_v29  ;;  %v1109_v35 = vadd.f32 %v1101_v53, %v2452_v16 }
 0x169   : > { %v1110_v39 = vadd.f32 %v1102_v44, %v2454_v41  ;;  %v1112_v21 = vmul.f32 0.7978846, %v1104_v34  ;;  %v1113_v42 = vmul.f32 0.7978846, %v1105_v63  ;;  %v1114_v22 = vmul.f32 0.7978846, %v1106_v60 }
 0x16a   : > { %v1115_v45 = vmul.f32 0.7978846, %v1107_v20  ;;  %1759 = vtanh.f32 %v1111_v47  ;;  %v1116_v50 = vmul.f32 0.7978846, %v1108_v61  ;;  %v1117_v28 = vmul.f32 0.7978846, %v1109_v35 }
 0x16b   : > { %1761 = vtanh.f32 %v1112_v21  ;;  %v1118_v33 = vmul.f32 0.7978846, %v1110_v39  ;;  %v1071_v40 = vmul.f32 0.5, %v1063_v0  ;;  %v1072_v10 = vmul.f32 0.5, %v1064_v55 }
 0x16c   : > { %1763 = vtanh.f32 %v1113_v42  ;;  %v1073_v57 = vmul.f32 0.5, %v1065_v23  ;;  %v1074_v12 = vmul.f32 0.5, %v1066_v32  ;;  %v1075_v46 = vmul.f32 0.5, %v2448_v51 }
 0x16d   : > { %1765 = vtanh.f32 %v1114_v22  ;;  %v1922_v54 = vmov 64.0   ;;  %v1076_v32 = vmul.f32 0.5, %v2450_v6  ;;  %v1077_v51 = vmul.f32 0.5, %v2452_v16 }
 0x16e   : > { %1767 = vtanh.f32 %v1115_v45  ;;  %v1078_v37 = vmul.f32 0.5, %v2454_v41  ;;  %v1656_v45 = vld [vmem:[#allocation6 + $0x8] sm:$0xff] }
 0x16f   : > { %1769 = vtanh.f32 %v1116_v50  ;;  %1288 = vmatpush.bf16.msra.mxu2 %v1656_v45  ;;  %v1655_v50 = vld [vmem:[#allocation6] sm:$0xff] }
 0x170   : > { %v1760_v36 = vpop.eup %1759  ;;  %1771 = vtanh.f32 %v1117_v28 }
 0x171   : > { %v1762_v26 = vpop.eup %1761  ;;  %1773 = vtanh.f32 %v1118_v33  ;;  %v1127_v27 = vadd.f32 1.0, %v1760_v36 }
 0x172   : > { %v1764_v58 = vpop.eup %1763  ;;  %v1128_v1 = vadd.f32 1.0, %v1762_v26  ;;  %1775 = vrcp.f32 %v1922_v54 }
 0x173   : > { %v1766_v19 = vpop.eup %1765  ;;  %v1129_v13 = vadd.f32 1.0, %v1764_v58  ;;  %v2472_v49 = vmul.f32 %v1127_v27, %v1071_v40  ;;  %1289 = vmatpush.bf16.msra.mxu2 %v1655_v50 }
 0x174   : > { %v1768_v56 = vpop.eup %1767  ;;  %v1130_v52 = vadd.f32 1.0, %v1766_v19  ;;  %v2475_v0 = vmul.f32 %v1128_v1, %v1072_v10 }
 0x175   : > { %v1770_v55 = vpop.eup %1769  ;;  %v1131_v15 = vadd.f32 1.0, %v1768_v56  ;;  %v2477_v23 = vmul.f32 %v1129_v13, %v1073_v57 }
 0x176   : > { %v1772_v14 = vpop.eup %1771  ;;  %v1132_v4 = vadd.f32 1.0, %v1770_v55  ;;  %v2480_v7 = vmul.f32 %v1130_v52, %v1074_v12  ;;  %v1143_v17 = vadd.f32 %v2475_v0, %v2472_v49  ;;  %v1664_v55 = vld [vmem:[%s2601_s7 + $0x38] sm:$0xff] }
 0x177   : > { %v1774_v18 = vpop.eup %1773  ;;  %v1133_v24 = vadd.f32 1.0, %v1772_v14  ;;  %v2485_v25 = vmul.f32 %v1131_v15, %v1075_v46  ;;  %1395 = vmatpush.bf16.msrb.mxu2 %v1664_v55  ;;  %1666 = vmatpush.bf16.msra.mxu3 %v1664_v55  ;;  %v1663_v15 = vld [vmem:[%s2601_s7 + $0x30] sm:$0xff]  ;;  %v1662_v14 = vld [vmem:[%s2601_s7 + $0x28] sm:$0xff] }
 0x178   : > { %v1144_v30 = vadd.f32 %v1143_v17, %v2477_v23  ;;  %v1776_v31 = vpop.eup %1775  ;;  %v1134_v62 = vadd.f32 1.0, %v1774_v18  ;;  %v2489_v38 = vmul.f32 %v1132_v4, %v1076_v32  ;;  %v1661_v32 = vld [vmem:[%s2601_s7 + $0x20] sm:$0xff]  ;;  %v1660_v4 = vld [vmem:[%s2601_s7 + $0x18] sm:$0xff]  ;;  %v1659_v17 = vld [vmem:[%s2601_s7 + $0x10] sm:$0xff] }
 0x179   : > { %v2492_v59 = vmul.f32 %v1133_v24, %v1077_v51  ;;  %v1157_v43 = vmul.f32 64.0, %v1776_v31  ;;  %vm1161_vm3 = vweird.f32 %v1776_v31  ;;  %v1658_v18 = vld [vmem:[%s2601_s7 + $0x8] sm:$0xff]  ;;  %v1657_v51 = vld [vmem:[%s2601_s7] sm:$0xff] }
 0x17a   : > { %v1145_v6 = vadd.f32 %v1144_v30, %v2480_v7  ;;  %v2495_v29 = vmul.f32 %v1134_v62, %v1078_v37 }
 0x17b   : > { %v1158_v44 = vsub.f32 1.0, %v1157_v43  ;;  %1396 = vmatpush.bf16.msrb.mxu2 %v1663_v15  ;;  %1667 = vmatpush.bf16.msra.mxu3 %v1663_v15 }
 0x17c   : > { %v1146_v48 = vadd.f32 %v1145_v6, %v2485_v25 }
 0x17d   : > { %v1159_v63 = vmul.f32 %v1776_v31, %v1158_v44 }
 0x17e   : > { %v1147_v16 = vadd.f32 %v1146_v48, %v2489_v38 }
 0x17f   : > { %v1160_v61 = vadd.f32 %v1776_v31, %v1159_v63  ;;  %1397 = vmatpush.bf16.msrb.mxu2 %v1662_v14  ;;  %1668 = vmatpush.bf16.msra.mxu3 %v1662_v14 }
 0x180   : > { %v1148_v53 = vadd.f32 %v1147_v16, %v2492_v59 }
 0x181   : > { %v1162_v39 = vsel %vm1161_vm3, %v1776_v31, %v1160_v61 }
 0x182   : > { %v1149_v34 = vadd.f32 %v1148_v53, %v2495_v29 }
 0x183   : > { %1398 = vmatpush.bf16.msrb.mxu2 %v1661_v32  ;;  %1669 = vmatpush.bf16.msra.mxu3 %v1661_v32 }
 0x184   : > { %v1150_v41 = vrot.slane %v1149_v34, 4 }
 0x186   : > { %v1151_v60 = vadd.f32 %v1150_v41, %v1149_v34 }
 0x187   : > { %1399 = vmatpush.bf16.msrb.mxu2 %v1660_v4  ;;  %1670 = vmatpush.bf16.msra.mxu3 %v1660_v4 }
 0x188   : > { %v1152_v20 = vrot.slane %v1151_v60, 2 }
 0x18a   : > { %v1153_v47 = vadd.f32 %v1152_v20, %v1151_v60 }
 0x18b   : > { %1400 = vmatpush.bf16.msrb.mxu2 %v1659_v17  ;;  %1671 = vmatpush.bf16.msra.mxu3 %v1659_v17 }
 0x18c   : > { %v1154_v35 = vrot.slane %v1153_v47, 1 }
 0x18e   : > { %v1155_v21 = vadd.f32 %v1154_v35, %v1153_v47 }
 0x18f   : > { %1401 = vmatpush.bf16.msrb.mxu2 %v1658_v18  ;;  %1672 = vmatpush.bf16.msra.mxu3 %v1658_v18 }
 0x190   : > { %v1163_v42 = vmul.f32 %v1162_v39, %v1155_v21 }
 0x192   : > { %v1164_v22 = vpack.c.bf16 %v1163_v42, %v1163_v42 }
 0x193   : > { %1402 = vmatpush.bf16.msrb.mxu2 %v1657_v51  ;;  %1673 = vmatpush.bf16.msra.mxu3 %v1657_v51 }
 0x194   : > { %1237 = vmatmul.bf16.vlgmr.msra.gmra.mxu1 %v1164_v22 }
 0x211   : > { %v1238_v28 = vpop.f32.mrf.mxu1 }
 0x212   : > { %v1596_v33 = vmul.f32 -1.442695, %v1238_v28 }
 0x214   : > { %1777 = vpow2.f32 %v1596_v33 }
 0x219   : > { %v1240_v40 = vpop.f32.mrf.mxu1 }
 0x21a   : > { %v1778_v36 = vpop.eup %1777 }
 0x21b   : > { %v1245_v10 = vadd.f32 1.0, %v1778_v36 }
 0x21d   : > { %1779 = vrcp.f32 %v1245_v10  ;;  %v1257_v58 = vand.u32 2147483648, %v1245_v10  ;;  %v1255_v1 = vand.u32 2147483647, %v1245_v10  ;;  %vm1251_vm5 = vweird.f32 %v1245_v10 }
 0x21f   : > { %v1258_v13 = vor.u32 1.1754944e-38, %v1257_v58  ;;  %vm1256_vm7 = vcmp.eq.f32.partialorder %v1255_v1, 8.507059e+37 }
 0x223   : > { %v1780_v26 = vpop.eup %1779 }
 0x224   : > { %v1247_v57 = vmul.f32 %v1780_v26, %v1245_v10  ;;  %vm1252_vm4 = vweird.f32 %v1780_v26 }
 0x225   : > { %vm1253_vm6 = vmor %vm1251_vm5, %vm1252_vm4 }
 0x226   : > { %v1248_v27 = vsub.f32 1.0, %v1247_v57 }
 0x228   : > { %v1249_v12 = vmul.f32 %v1780_v26, %v1248_v27 }
 0x22a   : > { %v1250_v19 = vadd.f32 %v1780_v26, %v1249_v12 }
 0x22c   : > { %v1254_v56 = vsel %vm1253_vm6, %v1780_v26, %v1250_v19 }
 0x22d   : > { %v1259_v46 = vsel %vm1256_vm7, %v1258_v13, %v1254_v56 }
 0x22e   : > { %v1261_v52 = vmul.f32 %v1259_v46, %v1238_v28 }
 0x230   : > { %v1262_v54 = vpack.c.bf16 %v1261_v52, %v1261_v52  ;;  %v2612_v52 = vld [vmem:[#allocation13_spill] sm:$0xff] }
 0x232   : > { %1605 = vmatmul.msk.bf16.vlgmr.msra.gmra.mxu2 %vm398_vm0, %v1262_v54 }
 0x2b5   : > { %v1291_v24 = vpop.f32.mrf.mxu2 }
 0x2b6   : > { %v1606_v30 = vmul.f32 -1.442695, %v1291_v24 }
 0x2b8   : > { %1781 = vpow2.f32 %v1606_v30 }
 0x2bd   : > { %v1293_v31 = vpop.f32.mrf.mxu2 }
 0x2be   : > { %v1782_v37 = vpop.eup %1781 }
 0x2bf   : > { %v1298_v62 = vadd.f32 1.0, %v1782_v37 }
 0x2c1   : > { %1783 = vrcp.f32 %v1298_v62  ;;  %v1310_v16 = vand.u32 2147483648, %v1298_v62  ;;  %v1308_v44 = vand.u32 2147483647, %v1298_v62  ;;  %vm1304_vm9 = vweird.f32 %v1298_v62 }
 0x2c3   : > { %v1311_v41 = vor.u32 1.1754944e-38, %v1310_v16  ;;  %vm1309_vm11 = vcmp.eq.f32.partialorder %v1308_v44, 8.507059e+37 }
 0x2c7   : > { %v1784_v6 = vpop.eup %1783 }
 0x2c8   : > { %v1300_v48 = vmul.f32 %v1784_v6, %v1298_v62  ;;  %vm1305_vm8 = vweird.f32 %v1784_v6 }
 0x2c9   : > { %vm1306_vm10 = vmor %vm1304_vm9, %vm1305_vm8 }
 0x2ca   : > { %v1301_v43 = vsub.f32 1.0, %v1300_v48 }
 0x2cc   : > { %v1302_v53 = vmul.f32 %v1784_v6, %v1301_v43 }
 0x2ce   : > { %v1303_v34 = vadd.f32 %v1784_v6, %v1302_v53 }
 0x2d0   : > { %v1307_v63 = vsel %vm1306_vm10, %v1784_v6, %v1303_v34 }
 0x2d1   : > { %v1312_v60 = vsel %vm1309_vm11, %v1311_v41, %v1307_v63 }
 0x2d2   : > { %v1314_v20 = vperm.slane %v1312_v60, 0 }
 0x2d4   : > { %v1315_v61 = vmul.f32 %v1314_v20, %v2472_v49  ;;  %v1316_v47 = vmul.f32 %v1314_v20, %v2475_v0  ;;  %v1319_v35 = vmul.f32 %v1314_v20, %v2485_v25  ;;  %v1320_v39 = vmul.f32 %v1314_v20, %v2489_v38  ;;  %v1758_v25 = vld [vmem:[%s2602_s8] ss:$0 sm:$0xff] }
 0x2d5   : > { %v1317_v22 = vmul.f32 %v1314_v20, %v2477_v23  ;;  %v1318_v45 = vmul.f32 %v1314_v20, %v2480_v7  ;;  %v1321_v50 = vmul.f32 %v1314_v20, %v2492_v59  ;;  %v1322_v49 = vmul.f32 %v1314_v20, %v2495_v29 }
 0x2d6   : > { %v1323_v21 = vpack.c.bf16 %v1316_v47, %v1315_v61  ;;  %v1325_v42 = vpack.c.bf16 %v1320_v39, %v1319_v35 }
 0x2d7   : > { %v1324_v28 = vpack.c.bf16 %v1318_v45, %v1317_v22  ;;  %v1326_v0 = vpack.c.bf16 %v1322_v49, %v1321_v50 }
 0x2d8   : > { %1403 = vmatmul.bf16.vlgmr.msrb.gmra.mxu2 %v1323_v21  ;;  %1413 = vmatmul.bf16.vlgmr.msra.gmra.mxu3 %v1325_v42 }
 0x2e8   : > { %1408 = vmatmul.bf16.gmra.mxu2 %v1324_v28  ;;  %1418 = vmatmul.bf16.gmra.mxu3 %v1326_v0 }
 0x35b   : > { %v1404_v38 = vpop.f32.mrf.mxu2  ;;  %v1414_v33 = vpop.f32.mrf.mxu3 }
 0x35c   : > { %v1405_v23 = vadd.f32 %v1758_v25, %v1404_v38  ;;  %v1415_v40 = vadd.f32 %v1758_v25, %v1414_v33 }
 0x35e   : > { %v1424_v7 = vadd.f32 %v1405_v23, %v2065_v2  ;;  %v1428_v59 = vadd.f32 %v1415_v40, %v2079_v8 }
 0x360   : > { %1432 = vst.msk [vmem:[%s2115_s25] sm:$0xff] %vm398_vm0, %v1424_v7 }
 0x361   : > { %1436 = vst.msk [vmem:[%s2115_s25 + $0x20] sm:$0xff] %vm398_vm0, %v1428_v59 }
 0x363   : > { %v1406_v29 = vpop.f32.mrf.mxu2  ;;  %v1416_v36 = vpop.f32.mrf.mxu3 }
 0x364   : > { %v1407_v10 = vadd.f32 %v1758_v25, %v1406_v29  ;;  %v1417_v26 = vadd.f32 %v1758_v25, %v1416_v36 }
 0x366   : > { %v1425_v57 = vadd.f32 %v1407_v10, %v2067_v3  ;;  %v1429_v27 = vadd.f32 %v1417_v26, %v2081_v9 }
 0x368   : > { %1433 = vst.msk [vmem:[%s2115_s25 + $0x8] sm:$0xff] %vm398_vm0, %v1425_v57 }
 0x369   : > { %1437 = vst.msk [vmem:[%s2115_s25 + $0x28] sm:$0xff] %vm398_vm0, %v1429_v27 }
 0x36b   : > { %v1409_v2 = vpop.f32.mrf.mxu2  ;;  %v1419_v8 = vpop.f32.mrf.mxu3 }
 0x36c   : > { %v1410_v58 = vadd.f32 %v1758_v25, %v1409_v2  ;;  %v1420_v12 = vadd.f32 %v1758_v25, %v1419_v8 }
 0x36e   : > { %v1426_v1 = vadd.f32 %v1410_v58, %v2072_v5  ;;  %v1430_v19 = vadd.f32 %v1420_v12, %v2086_v11  ;;  %v2611_v5 = vld [vmem:[#allocation12_spill] sm:$0xff] }
 0x370   : > { %1434 = vst.msk [vmem:[%s2115_s25 + $0x10] sm:$0xff] %vm398_vm0, %v1426_v1 }
 0x371   : > { %1438 = vst.msk [vmem:[%s2115_s25 + $0x30] sm:$0xff] %vm398_vm0, %v1430_v19 }
 0x373   : > { %v1411_v3 = vpop.f32.mrf.mxu2  ;;  %v1421_v9 = vpop.f32.mrf.mxu3 }
 0x374   : > { %v1412_v13 = vadd.f32 %v1758_v25, %v1411_v3  ;;  %v1422_v56 = vadd.f32 %v1758_v25, %v1421_v9 }
 0x376   : > { %v1427_v46 = vadd.f32 %v1412_v13, %v2611_v5  ;;  %v1431_v11 = vadd.f32 %v1422_v56, %v2612_v52 }
 0x378   : > { %1435 = vst.msk [vmem:[%s2115_s25 + $0x18] sm:$0xff] %vm398_vm0, %v1427_v46 }
 0x379   : > { %1439 = vst.msk [vmem:[%s2115_s25 + $0x38] sm:$0xff] %vm398_vm0, %v1431_v11 }
 0x37a   : > { %1872 = shalt.err (!%p1869_p9)
}
 0x37b   : > { %s1923_s23 = smov 128   ;;  %s1924_s25 = smov 8  }
 0x37c   : > { %1682 = dma.vmem_to_hbm [thread:$0]  (%p2013_p5), %s1454_s21, 1024, %s1456_s13, %s1441_s26, %s1923_s23, %s1923_s23, %s1924_s25  }
 0x37d PF: > { %p1699_p10 = scmp.ge.s32.totalorder %s1915_s12, 2  ;;  %s1470_s24 = sand.u32 1, %s1903_s30  }
 0x37e   : > { %s1471_s29 = scalar_lea.sflag [#allocation5], %s1470_s24 }
 0x37f   : > { %p1692_p11 = pnand %p1699_p10, %p2017_p6 }
 0x381   : > { %p1693_p12 = pneg %p1692_p11 }
 0x383   : > { %1898 = dma.done.wait (%p1693_p12), %s1471_s29, 1024  }
 0x384   : > { %1900 = vsyncadd (%p1693_p12), %s1471_s29, 4294966272  ;;  %p21_p13 = scmp.ge.s32.totalorder %s2000_s15, 4   ;;  %s2613_s30 = smov %s1907_s10 }
 0x385   : > { %s2614_s10 = smov %s1911_s11  ;;  %s2615_s11 = smov %s2011_s18 }
 0x386   : > { %s2616_s12 = smov %s2000_s15  ;;  %23 = sbr.rel (!%p21_p13) target bundleno = 5 (0x5), region = 105 }
 0x38b   :  { %1477 = vsyncpa [#allocation4], 1 }
 0x38c   :  { %1479 = vsyncpa [#allocation4 + $0x1], 1 }
 0x38d   :  { %1480 = vsyncpa [#allocation7], 1 }
 0x38e   :  { %1481 = vsyncpa [#allocation5], 1 }
 0x38f   :  { %1483 = vsyncpa [#allocation5 + $0x1], 1 }

</bundles_post_ra>
